<compile_context>
chip_gen: v5e
topology: v5e:2x2
jax: 0.10.0
libtpu: 0.0.40
codegen_flags: <defaults>
</compile_context>

<pallas_src>
import numpy as np
import jax
import jax.numpy as jnp
from jax.experimental import pallas as pl
from jax.experimental.pallas import tpu as pltpu

N_BLOCKS = 4
C = 20          # channels
K = 3           # conv kernel size
DIL = 2         # dilation
PAD = 1         # padding
L_IN = 142      # input length -> 140/70 -> 68/34 -> 32/16 -> 14/7
BN_EPS = 1e-5


def _block_dims(n):
    """Per block: (L_in, P=L+2, W=n*P, Lc, Lp, P_next, out_width)."""
    dims, L = [], L_IN
    for blk in range(N_BLOCKS):
        P = L + 2                      # per-segment padded length
        W = n * P                      # lane width of this block's padded input
        Lc = L - 2                     # Conv1d(k=3, s=1, p=1, dilation=2) output length
        Lp = Lc // 2                   # MaxPool1d(2, 2); Lc is even in every block
        Pn = Lp + 2                    # next block's per-segment padded length
        # blocks 0..2 emit the next block's padded layout (+4 slack cols for the stack
        # shifts); block 3 emits compact per-sample features for the head.
        outw = n * Pn + 4 if blk + 1 < N_BLOCKS else n * Lp
        dims.append((L, P, W, Lc, Lp, Pn, outw))
        L = Lp
    return dims


def testnet_kernel(x_ref, w_ref, scale_ref,
                   sel0_ref, sel1_ref, sel2_ref, sel3_ref,
                   shp0_ref, shp1_ref, shp2_ref, shp3_ref,
                   comb_ref, fcw_ref, headb_ref,
                   out_ref, hbuf, hstack):
    """Whole forward pass for the whole batch; all operands live in VMEM."""
    n = out_ref.shape[0]
    dims = _block_dims(n)
    sel_refs = (sel0_ref, sel1_ref, sel2_ref, sel3_ref)
    shp_refs = (shp0_ref, shp1_ref, shp2_ref, shp3_ref)

    h_last = None
    for blk, (L, P, W, Lc, Lp, Pn, outw) in enumerate(dims):   # 4 static iterations
        src = x_ref if blk == 0 else hbuf
        # Shifted stack: rows [k*C, (k+1)*C) hold the padded input shifted by 2k lanes,
        # so the dilated conv becomes ONE matmul with contraction depth 3C = 60.
        for k in range(K):
            hstack[k * C:(k + 1) * C, 0:W] = src[:, 2 * k:2 * k + W]
        conv = jnp.dot(w_ref[blk], hstack[:, 0:W],
                       preferred_element_type=jnp.float32)              # (C, W) f32
        # MaxPool1d(2,2): pairwise max with the 1-lane-shifted conv, then ONE even-col
        # selection matmul that also re-pads / re-packs the batch segments.
        m = jnp.maximum(conv[:, 0:W - 1], conv[:, 1:W]).astype(jnp.bfloat16)
        pooled = jnp.dot(m, sel_refs[blk][...],
                         preferred_element_type=jnp.float32)            # (C, outw) f32
        # Conv bias + BatchNorm(eval) folded into per-channel scale + masked shift; ReLU.
        # TODO(synk): Dropout(0.2) is train-time stochastic; eval-mode identity here.
        h = jnp.maximum(pooled * scale_ref[blk] + shp_refs[blk][...], 0.0)
        if blk + 1 < N_BLOCKS:
            hbuf[:, 0:outw] = h.astype(jnp.bfloat16)                    # next block input
        else:
            h_last = h                                                  # (C, n*7) f32

    # ---- head: combine(20->1, k=1) as a (1,C)x(C,n*7) matmul, fc(7->2) per sample ----
    Lpf = dims[-1][4]                                                   # = 7
    t = jnp.dot(comb_ref[...], h_last, preferred_element_type=jnp.float32)   # (1, n*7)
    logits = [jnp.dot(t[:, b * Lpf:(b + 1) * Lpf], fcw_ref[...],
                      preferred_element_type=jnp.float32) + headb_ref[...]
              for b in range(n)]                                        # n x (1, 2)

    # ---- Softmax(dim=0): normalize across the batch, as in the PyTorch module ----
    mx = logits[0]
    for b in range(1, n):
        mx = jnp.maximum(mx, logits[b])
    es = [jnp.exp(l - mx) for l in logits]
    den = es[0]
    for b in range(1, n):
        den = den + es[b]
    inv = 1.0 / den
    for b in range(n):
        out_ref[b:b + 1, :] = es[b] * inv


def _selectors_and_shift_planes(n, shift):
    """Per block: bf16 pooling selector (W-1, outw) and f32 masked shift plane (C, outw).

    sel[b*P + 2i, col] = 1 picks max(conv[2i], conv[2i+1]) of segment b into output `col`
    (col = b*Pn + 1 + i in the re-padded layout, or b*Lp + i compactly for the last block).
    The shift plane is the BN/bias shift broadcast over data columns and 0 on pad columns.
    """
    sels, shps = [], []
    for blk, (L, P, W, Lc, Lp, Pn, outw) in enumerate(_block_dims(n)):
        sel = np.zeros((W - 1, outw), np.float32)
        mask = np.zeros((outw,), np.float32)
        for b in range(n):
            for i in range(Lp):
                col = b * Pn + 1 + i if blk + 1 < N_BLOCKS else b * Lp + i
                sel[b * P + 2 * i, col] = 1.0
                mask[col] = 1.0
        sels.append(jnp.asarray(sel, dtype=jnp.bfloat16))               # 0/1 exact in bf16
        shps.append(shift[blk][:, None] * jnp.asarray(mask)[None, :])   # (C, outw) f32
    return sels, shps


def init_params(key):
    """Parameters in (approximately) PyTorch layout."""
    ks = jax.random.split(key, 10)
    conv_w = jax.random.normal(ks[0], (N_BLOCKS, C, C, K), jnp.float32) / jnp.sqrt(C * K)
    conv_b = 0.05 * jax.random.normal(ks[1], (N_BLOCKS, C), jnp.float32)
    bn_g = 1.0 + 0.1 * jax.random.normal(ks[2], (N_BLOCKS, C), jnp.float32)
    bn_b = 0.1 * jax.random.normal(ks[3], (N_BLOCKS, C), jnp.float32)
    bn_mean = 0.1 * jax.random.normal(ks[4], (N_BLOCKS, C), jnp.float32)
    bn_var = 0.5 + jax.random.uniform(ks[5], (N_BLOCKS, C), jnp.float32)
    comb_w = jax.random.normal(ks[6], (1, C, 1), jnp.float32) / jnp.sqrt(C)   # Conv1d(20->1,k=1)
    comb_b = 0.05 * jax.random.normal(ks[7], (1,), jnp.float32)
    fc_w = jax.random.normal(ks[8], (2, 7), jnp.float32) / jnp.sqrt(7.0)      # Linear(7,2)
    fc_b = 0.05 * jax.random.normal(ks[9], (2,), jnp.float32)
    return conv_w, conv_b, bn_g, bn_b, bn_mean, bn_var, comb_w, comb_b, fc_w, fc_b


@jax.jit
def testnet_forward(x, params):
    (conv_w, conv_b, bn_g, bn_b, bn_mean, bn_var,
     comb_w, comb_b, fc_w, fc_b) = params
    n = x.shape[0]
    dims = _block_dims(n)
    assert dims[-1][4] == 7, "length bookkeeping must end at 7 features (Linear(7, 2))"

    # ---- layout plumbing: batch folded onto the lane axis, zero padding baked in ----
    W0 = dims[0][2]                                                         # n * (L_IN+2)
    xp = jnp.pad(x.astype(jnp.float32), ((0, 0), (0, 0), (PAD, PAD)))       # (n, C, L+2)
    xp = jnp.transpose(xp, (1, 0, 2)).reshape(C, W0)                        # (C, n*(L+2))
    xp = jnp.pad(xp, ((0, 0), (0, 4))).astype(jnp.bfloat16)                 # (C, W0+4)

    # ---- shared (un-batched) parameters ----
    # Conv taps stacked along the CONTRACTION axis: w_all[blk][c, k*C+ci] = conv_w[blk,c,ci,k]
    w_all = jnp.concatenate([conv_w[..., k] for k in range(K)],
                            axis=2).astype(jnp.bfloat16)                    # (4, C, 3C)
    # BatchNorm(eval) + conv bias folded into a post-pool per-channel scale/shift (exact:
    # per-channel bias commutes with max-pool; scale applied after the max).
    scale = bn_g * jax.lax.rsqrt(bn_var + BN_EPS)                           # (4, C)
    shift = bn_b + (conv_b - bn_mean) * scale                               # (4, C)
    sels, shps = _selectors_and_shift_planes(n, shift)
    scale = scale[..., None]                                                # (4, C, 1)
    comb_row = comb_w[:, :, 0]                                              # (1, C)
    fcw_t = fc_w.T                                                          # (7, 2)
    head_b = (comb_b[0] * jnp.sum(fcw_t, axis=0) + fc_b)[None, :]           # (1, 2)

    operands = (xp, w_all, scale, *sels, *shps, comb_row, fcw_t, head_b)
    vmem = pltpu.MemorySpace.VMEM
    return pl.pallas_call(
        testnet_kernel,
        out_shape=jax.ShapeDtypeStruct((n, 2), jnp.float32),
        in_specs=[pl.BlockSpec(memory_space=vmem)] * len(operands),
        out_specs=pl.BlockSpec(memory_space=vmem),
        scratch_shapes=[pltpu.VMEM((C, dims[0][6]), jnp.bfloat16),          # activations
                        pltpu.VMEM((3 * C, dims[0][2]), jnp.bfloat16)],     # conv tap stack
        cost_estimate=pl.CostEstimate(flops=4_000_000, transcendentals=8,
                                      bytes_accessed=170_000),
    )(*operands)


def testnet_reference(x, params):
    """Direct (non-Pallas) translation of the PyTorch module, for validation."""
    (conv_w, conv_b, bn_g, bn_b, bn_mean, bn_var,
     comb_w, comb_b, fc_w, fc_b) = params
    h = x
    for blk in range(N_BLOCKS):
        L = h.shape[-1]
        Lc = L - 2
        hp = jnp.pad(h, ((0, 0), (0, 0), (PAD, PAD)))
        conv = sum(jnp.einsum('oc,ncl->nol', conv_w[blk, :, :, k],
                              hp[:, :, k * DIL:k * DIL + Lc]) for k in range(K))
        conv = conv + conv_b[blk][None, :, None]
        Lp = (Lc - 2) // 2 + 1
        pooled = jnp.maximum(conv[:, :, 0:2 * Lp:2], conv[:, :, 1:2 * Lp:2])
        z = (pooled - bn_mean[blk][None, :, None]) * jax.lax.rsqrt(
            bn_var[blk][None, :, None] + BN_EPS)
        z = z * bn_g[blk][None, :, None] + bn_b[blk][None, :, None]
        h = jnp.maximum(z, 0.0)
    feat = jnp.einsum('oc,ncl->nol', comb_w[:, :, 0], h)[:, 0, :] + comb_b[0]
    out = feat @ fc_w.T + fc_b[None, :]
    return jax.nn.softmax(out, axis=0)


if __name__ == "__main__":
    key = jax.random.PRNGKey(0)
    kx, kp = jax.random.split(key)
    x = jax.random.normal(kx, (2, C, L_IN), jnp.float32)    # (batch=2, C=20, L=142)
    params = init_params(kp)

    out = testnet_forward(x, params)
    jax.block_until_ready(out)

    assert out.shape == (2, 2)
    # Softmax over dim=0: each column of the (batch, 2) output sums to 1.
    assert jnp.allclose(jnp.sum(out, axis=0), jnp.ones((2,)), atol=1e-4)
    # Match the plain-JAX f32 reference (kernel uses bf16 MXU operands, f32 accumulation).
    ref = testnet_reference(x, params)
    assert jnp.allclose(out, ref, atol=2e-2, rtol=2e-2), (out, ref)
    print("KERNEL_OK")
</pallas_src>

<mosaic_0001>
module attributes {stable_mosaic.version = 11 : i64} {
  func.func @testnet_kernel(%arg0: memref<20x292xbf16, #tpu.memory_space<vmem>>, %arg1: memref<4x20x60xbf16, #tpu.memory_space<vmem>>, %arg2: memref<4x20x1xf32, #tpu.memory_space<vmem>>, %arg3: memref<287x148xbf16, #tpu.memory_space<vmem>>, %arg4: memref<143x76xbf16, #tpu.memory_space<vmem>>, %arg5: memref<71x40xbf16, #tpu.memory_space<vmem>>, %arg6: memref<35x14xbf16, #tpu.memory_space<vmem>>, %arg7: memref<20x148xf32, #tpu.memory_space<vmem>>, %arg8: memref<20x76xf32, #tpu.memory_space<vmem>>, %arg9: memref<20x40xf32, #tpu.memory_space<vmem>>, %arg10: memref<20x14xf32, #tpu.memory_space<vmem>>, %arg11: memref<1x20xf32, #tpu.memory_space<vmem>>, %arg12: memref<7x2xf32, #tpu.memory_space<vmem>>, %arg13: memref<1x2xf32, #tpu.memory_space<vmem>>, %arg14: memref<2x2xf32, #tpu.memory_space<vmem>>, %arg15: memref<20x148xbf16, #tpu.memory_space<vmem>>, %arg16: memref<60x288xbf16, #tpu.memory_space<vmem>>) attributes {dimension_semantics = [], scalar_prefetch = 0 : i64, scratch_operands = 2 : i64, tpu.core_type = #tpu.core_type<tc>} {
    %c0 = arith.constant 0 : index
    %c0_0 = arith.constant 0 : index
    %0 = vector.load %arg0[%c0, %c0_0] : memref<20x292xbf16, #tpu.memory_space<vmem>>, vector<20x288xbf16>
    %c0_1 = arith.constant 0 : index
    %c0_2 = arith.constant 0 : index
    %1 = vector.load %arg16[%c0_1, %c0_2] : memref<60x288xbf16, #tpu.memory_space<vmem>>, vector<20x288xbf16>
    tpu.vector_store %arg16[%c0_1, %c0_2], %0 {strides = array<i32>} : memref<60x288xbf16, #tpu.memory_space<vmem>>, vector<20x288xbf16>,
    %c0_3 = arith.constant 0 : index
    %c2 = arith.constant 2 : index
    %2 = vector.load %arg0[%c0_3, %c2] : memref<20x292xbf16, #tpu.memory_space<vmem>>, vector<20x288xbf16>
    %c20 = arith.constant 20 : index
    %c0_4 = arith.constant 0 : index
    %3 = vector.load %arg16[%c20, %c0_4] : memref<60x288xbf16, #tpu.memory_space<vmem>>, vector<20x288xbf16>
    tpu.vector_store %arg16[%c20, %c0_4], %2 {strides = array<i32>} : memref<60x288xbf16, #tpu.memory_space<vmem>>, vector<20x288xbf16>,
    %c0_5 = arith.constant 0 : index
    %c4 = arith.constant 4 : index
    %4 = vector.load %arg0[%c0_5, %c4] : memref<20x292xbf16, #tpu.memory_space<vmem>>, vector<20x288xbf16>
    %c40 = arith.constant 40 : index
    %c0_6 = arith.constant 0 : index
    %5 = vector.load %arg16[%c40, %c0_6] : memref<60x288xbf16, #tpu.memory_space<vmem>>, vector<20x288xbf16>
    tpu.vector_store %arg16[%c40, %c0_6], %4 {strides = array<i32>} : memref<60x288xbf16, #tpu.memory_space<vmem>>, vector<20x288xbf16>,
    %c0_7 = arith.constant 0 : index
    %c0_8 = arith.constant 0 : index
    %c0_9 = arith.constant 0 : index
    %6 = vector.load %arg1[%c0_7, %c0_8, %c0_9] : memref<4x20x60xbf16, #tpu.memory_space<vmem>>, vector<1x20x60xbf16>
    %7 = vector.shape_cast %6 : vector<1x20x60xbf16> to vector<20x60xbf16>
    %c0_10 = arith.constant 0 : index
    %c0_11 = arith.constant 0 : index
    %8 = vector.load %arg16[%c0_10, %c0_11] : memref<60x288xbf16, #tpu.memory_space<vmem>>, vector<60x288xbf16>
    %cst = arith.constant dense<0.000000e+00> : vector<20x288xf32>
    %9 = tpu.matmul %7, %8, %cst {dimension_numbers = #tpu.dot_dimension_numbers<[1], [0], [0], [1], [0, 0, 1, 1], [], []>} : vector<20x60xbf16>, vector<60x288xbf16>, vector<20x288xf32> -> vector<20x288xf32>
    %10 = vector.extract_strided_slice %9 {offsets = [0, 0], sizes = [20, 287], strides = [1, 1]} : vector<20x288xf32> to vector<20x287xf32>
    %11 = vector.extract_strided_slice %9 {offsets = [0, 1], sizes = [20, 287], strides = [1, 1]} : vector<20x288xf32> to vector<20x287xf32>
    %12 = arith.maximumf %10, %11 : vector<20x287xf32>
    %13 = arith.truncf %12 : vector<20x287xf32> to vector<20x287xbf16>
    %c0_12 = arith.constant 0 : index
    %c0_13 = arith.constant 0 : index
    %14 = vector.load %arg3[%c0_12, %c0_13] : memref<287x148xbf16, #tpu.memory_space<vmem>>, vector<287x148xbf16>
    %cst_14 = arith.constant dense<0.000000e+00> : vector<20x148xf32>
    %15 = tpu.matmul %13, %14, %cst_14 {dimension_numbers = #tpu.dot_dimension_numbers<[1], [0], [0], [1], [0, 0, 1, 1], [], []>} : vector<20x287xbf16>, vector<287x148xbf16>, vector<20x148xf32> -> vector<20x148xf32>
    %c0_15 = arith.constant 0 : index
    %c0_16 = arith.constant 0 : index
    %c0_17 = arith.constant 0 : index
    %16 = vector.load %arg2[%c0_15, %c0_16, %c0_17] : memref<4x20x1xf32, #tpu.memory_space<vmem>>, vector<1x20x1xf32>
    %17 = vector.shape_cast %16 : vector<1x20x1xf32> to vector<20x1xf32>
    %18 = vector.broadcast %17 : vector<20x1xf32> to vector<20x148xf32>
    %19 = arith.mulf %15, %18 : vector<20x148xf32>
    %c0_18 = arith.constant 0 : index
    %c0_19 = arith.constant 0 : index
    %20 = vector.load %arg7[%c0_18, %c0_19] : memref<20x148xf32, #tpu.memory_space<vmem>>, vector<20x148xf32>
    %21 = arith.addf %19, %20 : vector<20x148xf32>
    %cst_20 = arith.constant 0.000000e+00 : f32
    %22 = vector.broadcast %cst_20 : f32 to vector<20x148xf32>
    %23 = arith.maximumf %21, %22 : vector<20x148xf32>
    %24 = arith.truncf %23 : vector<20x148xf32> to vector<20x148xbf16>
    %c0_21 = arith.constant 0 : index
    %c0_22 = arith.constant 0 : index
    %25 = vector.load %arg15[%c0_21, %c0_22] : memref<20x148xbf16, #tpu.memory_space<vmem>>, vector<20x148xbf16>
    tpu.vector_store %arg15[%c0_21, %c0_22], %24 {strides = array<i32>} : memref<20x148xbf16, #tpu.memory_space<vmem>>, vector<20x148xbf16>,
    %c0_23 = arith.constant 0 : index
    %c0_24 = arith.constant 0 : index
    %26 = vector.load %arg15[%c0_23, %c0_24] : memref<20x148xbf16, #tpu.memory_space<vmem>>, vector<20x144xbf16>
    %c0_25 = arith.constant 0 : index
    %c0_26 = arith.constant 0 : index
    %27 = vector.load %arg16[%c0_25, %c0_26] : memref<60x288xbf16, #tpu.memory_space<vmem>>, vector<20x144xbf16>
    tpu.vector_store %arg16[%c0_25, %c0_26], %26 {strides = array<i32>} : memref<60x288xbf16, #tpu.memory_space<vmem>>, vector<20x144xbf16>,
    %c0_27 = arith.constant 0 : index
    %c2_28 = arith.constant 2 : index
    %28 = vector.load %arg15[%c0_27, %c2_28] : memref<20x148xbf16, #tpu.memory_space<vmem>>, vector<20x144xbf16>
    %c20_29 = arith.constant 20 : index
    %c0_30 = arith.constant 0 : index
    %29 = vector.load %arg16[%c20_29, %c0_30] : memref<60x288xbf16, #tpu.memory_space<vmem>>, vector<20x144xbf16>
    tpu.vector_store %arg16[%c20_29, %c0_30], %28 {strides = array<i32>} : memref<60x288xbf16, #tpu.memory_space<vmem>>, vector<20x144xbf16>,
    %c0_31 = arith.constant 0 : index
    %c4_32 = arith.constant 4 : index
    %30 = vector.load %arg15[%c0_31, %c4_32] : memref<20x148xbf16, #tpu.memory_space<vmem>>, vector<20x144xbf16>
    %c40_33 = arith.constant 40 : index
    %c0_34 = arith.constant 0 : index
    %31 = vector.load %arg16[%c40_33, %c0_34] : memref<60x288xbf16, #tpu.memory_space<vmem>>, vector<20x144xbf16>
    tpu.vector_store %arg16[%c40_33, %c0_34], %30 {strides = array<i32>} : memref<60x288xbf16, #tpu.memory_space<vmem>>, vector<20x144xbf16>,
    %c1 = arith.constant 1 : index
    %c0_35 = arith.constant 0 : index
    %c0_36 = arith.constant 0 : index
    %32 = vector.load %arg1[%c1, %c0_35, %c0_36] : memref<4x20x60xbf16, #tpu.memory_space<vmem>>, vector<1x20x60xbf16>
    %33 = vector.shape_cast %32 : vector<1x20x60xbf16> to vector<20x60xbf16>
    %c0_37 = arith.constant 0 : index
    %c0_38 = arith.constant 0 : index
    %34 = vector.load %arg16[%c0_37, %c0_38] : memref<60x288xbf16, #tpu.memory_space<vmem>>, vector<60x144xbf16>
    %cst_39 = arith.constant dense<0.000000e+00> : vector<20x144xf32>
    %35 = tpu.matmul %33, %34, %cst_39 {dimension_numbers = #tpu.dot_dimension_numbers<[1], [0], [0], [1], [0, 0, 1, 1], [], []>} : vector<20x60xbf16>, vector<60x144xbf16>, vector<20x144xf32> -> vector<20x144xf32>
    %36 = vector.extract_strided_slice %35 {offsets = [0, 0], sizes = [20, 143], strides = [1, 1]} : vector<20x144xf32> to vector<20x143xf32>
    %37 = vector.extract_strided_slice %35 {offsets = [0, 1], sizes = [20, 143], strides = [1, 1]} : vector<20x144xf32> to vector<20x143xf32>
    %38 = arith.maximumf %36, %37 : vector<20x143xf32>
    %39 = arith.truncf %38 : vector<20x143xf32> to vector<20x143xbf16>
    %c0_40 = arith.constant 0 : index
    %c0_41 = arith.constant 0 : index
    %40 = vector.load %arg4[%c0_40, %c0_41] : memref<143x76xbf16, #tpu.memory_space<vmem>>, vector<143x76xbf16>
    %cst_42 = arith.constant dense<0.000000e+00> : vector<20x76xf32>
    %41 = tpu.matmul %39, %40, %cst_42 {dimension_numbers = #tpu.dot_dimension_numbers<[1], [0], [0], [1], [0, 0, 1, 1], [], []>} : vector<20x143xbf16>, vector<143x76xbf16>, vector<20x76xf32> -> vector<20x76xf32>
    %c1_43 = arith.constant 1 : index
    %c0_44 = arith.constant 0 : index
    %c0_45 = arith.constant 0 : index
    %42 = vector.load %arg2[%c1_43, %c0_44, %c0_45] : memref<4x20x1xf32, #tpu.memory_space<vmem>>, vector<1x20x1xf32>
    %43 = vector.shape_cast %42 : vector<1x20x1xf32> to vector<20x1xf32>
    %44 = vector.broadcast %43 : vector<20x1xf32> to vector<20x76xf32>
    %45 = arith.mulf %41, %44 : vector<20x76xf32>
    %c0_46 = arith.constant 0 : index
    %c0_47 = arith.constant 0 : index
    %46 = vector.load %arg8[%c0_46, %c0_47] : memref<20x76xf32, #tpu.memory_space<vmem>>, vector<20x76xf32>
    %47 = arith.addf %45, %46 : vector<20x76xf32>
    %cst_48 = arith.constant 0.000000e+00 : f32
    %48 = vector.broadcast %cst_48 : f32 to vector<20x76xf32>
    %49 = arith.maximumf %47, %48 : vector<20x76xf32>
    %50 = arith.truncf %49 : vector<20x76xf32> to vector<20x76xbf16>
    %c0_49 = arith.constant 0 : index
    %c0_50 = arith.constant 0 : index
    %51 = vector.load %arg15[%c0_49, %c0_50] : memref<20x148xbf16, #tpu.memory_space<vmem>>, vector<20x76xbf16>
    tpu.vector_store %arg15[%c0_49, %c0_50], %50 {strides = array<i32>} : memref<20x148xbf16, #tpu.memory_space<vmem>>, vector<20x76xbf16>,
    %c0_51 = arith.constant 0 : index
    %c0_52 = arith.constant 0 : index
    %52 = vector.load %arg15[%c0_51, %c0_52] : memref<20x148xbf16, #tpu.memory_space<vmem>>, vector<20x72xbf16>
    %c0_53 = arith.constant 0 : index
    %c0_54 = arith.constant 0 : index
    %53 = vector.load %arg16[%c0_53, %c0_54] : memref<60x288xbf16, #tpu.memory_space<vmem>>, vector<20x72xbf16>
    tpu.vector_store %arg16[%c0_53, %c0_54], %52 {strides = array<i32>} : memref<60x288xbf16, #tpu.memory_space<vmem>>, vector<20x72xbf16>,
    %c0_55 = arith.constant 0 : index
    %c2_56 = arith.constant 2 : index
    %54 = vector.load %arg15[%c0_55, %c2_56] : memref<20x148xbf16, #tpu.memory_space<vmem>>, vector<20x72xbf16>
    %c20_57 = arith.constant 20 : index
    %c0_58 = arith.constant 0 : index
    %55 = vector.load %arg16[%c20_57, %c0_58] : memref<60x288xbf16, #tpu.memory_space<vmem>>, vector<20x72xbf16>
    tpu.vector_store %arg16[%c20_57, %c0_58], %54 {strides = array<i32>} : memref<60x288xbf16, #tpu.memory_space<vmem>>, vector<20x72xbf16>,
    %c0_59 = arith.constant 0 : index
    %c4_60 = arith.constant 4 : index
    %56 = vector.load %arg15[%c0_59, %c4_60] : memref<20x148xbf16, #tpu.memory_space<vmem>>, vector<20x72xbf16>
    %c40_61 = arith.constant 40 : index
    %c0_62 = arith.constant 0 : index
    %57 = vector.load %arg16[%c40_61, %c0_62] : memref<60x288xbf16, #tpu.memory_space<vmem>>, vector<20x72xbf16>
    tpu.vector_store %arg16[%c40_61, %c0_62], %56 {strides = array<i32>} : memref<60x288xbf16, #tpu.memory_space<vmem>>, vector<20x72xbf16>,
    %c2_63 = arith.constant 2 : index
    %c0_64 = arith.constant 0 : index
    %c0_65 = arith.constant 0 : index
    %58 = vector.load %arg1[%c2_63, %c0_64, %c0_65] : memref<4x20x60xbf16, #tpu.memory_space<vmem>>, vector<1x20x60xbf16>
    %59 = vector.shape_cast %58 : vector<1x20x60xbf16> to vector<20x60xbf16>
    %c0_66 = arith.constant 0 : index
    %c0_67 = arith.constant 0 : index
    %60 = vector.load %arg16[%c0_66, %c0_67] : memref<60x288xbf16, #tpu.memory_space<vmem>>, vector<60x72xbf16>
    %cst_68 = arith.constant dense<0.000000e+00> : vector<20x72xf32>
    %61 = tpu.matmul %59, %60, %cst_68 {dimension_numbers = #tpu.dot_dimension_numbers<[1], [0], [0], [1], [0, 0, 1, 1], [], []>} : vector<20x60xbf16>, vector<60x72xbf16>, vector<20x72xf32> -> vector<20x72xf32>
    %62 = vector.extract_strided_slice %61 {offsets = [0, 0], sizes = [20, 71], strides = [1, 1]} : vector<20x72xf32> to vector<20x71xf32>
    %63 = vector.extract_strided_slice %61 {offsets = [0, 1], sizes = [20, 71], strides = [1, 1]} : vector<20x72xf32> to vector<20x71xf32>
    %64 = arith.maximumf %62, %63 : vector<20x71xf32>
    %65 = arith.truncf %64 : vector<20x71xf32> to vector<20x71xbf16>
    %c0_69 = arith.constant 0 : index
    %c0_70 = arith.constant 0 : index
    %66 = vector.load %arg5[%c0_69, %c0_70] : memref<71x40xbf16, #tpu.memory_space<vmem>>, vector<71x40xbf16>
    %cst_71 = arith.constant dense<0.000000e+00> : vector<20x40xf32>
    %67 = tpu.matmul %65, %66, %cst_71 {dimension_numbers = #tpu.dot_dimension_numbers<[1], [0], [0], [1], [0, 0, 1, 1], [], []>} : vector<20x71xbf16>, vector<71x40xbf16>, vector<20x40xf32> -> vector<20x40xf32>
    %c2_72 = arith.constant 2 : index
    %c0_73 = arith.constant 0 : index
    %c0_74 = arith.constant 0 : index
    %68 = vector.load %arg2[%c2_72, %c0_73, %c0_74] : memref<4x20x1xf32, #tpu.memory_space<vmem>>, vector<1x20x1xf32>
    %69 = vector.shape_cast %68 : vector<1x20x1xf32> to vector<20x1xf32>
    %70 = vector.broadcast %69 : vector<20x1xf32> to vector<20x40xf32>
    %71 = arith.mulf %67, %70 : vector<20x40xf32>
    %c0_75 = arith.constant 0 : index
    %c0_76 = arith.constant 0 : index
    %72 = vector.load %arg9[%c0_75, %c0_76] : memref<20x40xf32, #tpu.memory_space<vmem>>, vector<20x40xf32>
    %73 = arith.addf %71, %72 : vector<20x40xf32>
    %cst_77 = arith.constant 0.000000e+00 : f32
    %74 = vector.broadcast %cst_77 : f32 to vector<20x40xf32>
    %75 = arith.maximumf %73, %74 : vector<20x40xf32>
    %76 = arith.truncf %75 : vector<20x40xf32> to vector<20x40xbf16>
    %c0_78 = arith.constant 0 : index
    %c0_79 = arith.constant 0 : index
    %77 = vector.load %arg15[%c0_78, %c0_79] : memref<20x148xbf16, #tpu.memory_space<vmem>>, vector<20x40xbf16>
    tpu.vector_store %arg15[%c0_78, %c0_79], %76 {strides = array<i32>} : memref<20x148xbf16, #tpu.memory_space<vmem>>, vector<20x40xbf16>,
    %c0_80 = arith.constant 0 : index
    %c0_81 = arith.constant 0 : index
    %78 = vector.load %arg15[%c0_80, %c0_81] : memref<20x148xbf16, #tpu.memory_space<vmem>>, vector<20x36xbf16>
    %c0_82 = arith.constant 0 : index
    %c0_83 = arith.constant 0 : index
    %79 = vector.load %arg16[%c0_82, %c0_83] : memref<60x288xbf16, #tpu.memory_space<vmem>>, vector<20x36xbf16>
    tpu.vector_store %arg16[%c0_82, %c0_83], %78 {strides = array<i32>} : memref<60x288xbf16, #tpu.memory_space<vmem>>, vector<20x36xbf16>,
    %c0_84 = arith.constant 0 : index
    %c2_85 = arith.constant 2 : index
    %80 = vector.load %arg15[%c0_84, %c2_85] : memref<20x148xbf16, #tpu.memory_space<vmem>>, vector<20x36xbf16>
    %c20_86 = arith.constant 20 : index
    %c0_87 = arith.constant 0 : index
    %81 = vector.load %arg16[%c20_86, %c0_87] : memref<60x288xbf16, #tpu.memory_space<vmem>>, vector<20x36xbf16>
    tpu.vector_store %arg16[%c20_86, %c0_87], %80 {strides = array<i32>} : memref<60x288xbf16, #tpu.memory_space<vmem>>, vector<20x36xbf16>,
    %c0_88 = arith.constant 0 : index
    %c4_89 = arith.constant 4 : index
    %82 = vector.load %arg15[%c0_88, %c4_89] : memref<20x148xbf16, #tpu.memory_space<vmem>>, vector<20x36xbf16>
    %c40_90 = arith.constant 40 : index
    %c0_91 = arith.constant 0 : index
    %83 = vector.load %arg16[%c40_90, %c0_91] : memref<60x288xbf16, #tpu.memory_space<vmem>>, vector<20x36xbf16>
    tpu.vector_store %arg16[%c40_90, %c0_91], %82 {strides = array<i32>} : memref<60x288xbf16, #tpu.memory_space<vmem>>, vector<20x36xbf16>,
    %c3 = arith.constant 3 : index
    %c0_92 = arith.constant 0 : index
    %c0_93 = arith.constant 0 : index
    %84 = vector.load %arg1[%c3, %c0_92, %c0_93] : memref<4x20x60xbf16, #tpu.memory_space<vmem>>, vector<1x20x60xbf16>
    %85 = vector.shape_cast %84 : vector<1x20x60xbf16> to vector<20x60xbf16>
    %c0_94 = arith.constant 0 : index
    %c0_95 = arith.constant 0 : index
    %86 = vector.load %arg16[%c0_94, %c0_95] : memref<60x288xbf16, #tpu.memory_space<vmem>>, vector<60x36xbf16>
    %cst_96 = arith.constant dense<0.000000e+00> : vector<20x36xf32>
    %87 = tpu.matmul %85, %86, %cst_96 {dimension_numbers = #tpu.dot_dimension_numbers<[1], [0], [0], [1], [0, 0, 1, 1], [], []>} : vector<20x60xbf16>, vector<60x36xbf16>, vector<20x36xf32> -> vector<20x36xf32>
    %88 = vector.extract_strided_slice %87 {offsets = [0, 0], sizes = [20, 35], strides = [1, 1]} : vector<20x36xf32> to vector<20x35xf32>
    %89 = vector.extract_strided_slice %87 {offsets = [0, 1], sizes = [20, 35], strides = [1, 1]} : vector<20x36xf32> to vector<20x35xf32>
    %90 = arith.maximumf %88, %89 : vector<20x35xf32>
    %91 = arith.truncf %90 : vector<20x35xf32> to vector<20x35xbf16>
    %c0_97 = arith.constant 0 : index
    %c0_98 = arith.constant 0 : index
    %92 = vector.load %arg6[%c0_97, %c0_98] : memref<35x14xbf16, #tpu.memory_space<vmem>>, vector<35x14xbf16>
    %cst_99 = arith.constant dense<0.000000e+00> : vector<20x14xf32>
    %93 = tpu.matmul %91, %92, %cst_99 {dimension_numbers = #tpu.dot_dimension_numbers<[1], [0], [0], [1], [0, 0, 1, 1], [], []>} : vector<20x35xbf16>, vector<35x14xbf16>, vector<20x14xf32> -> vector<20x14xf32>
    %c3_100 = arith.constant 3 : index
    %c0_101 = arith.constant 0 : index
    %c0_102 = arith.constant 0 : index
    %94 = vector.load %arg2[%c3_100, %c0_101, %c0_102] : memref<4x20x1xf32, #tpu.memory_space<vmem>>, vector<1x20x1xf32>
    %95 = vector.shape_cast %94 : vector<1x20x1xf32> to vector<20x1xf32>
    %96 = vector.broadcast %95 : vector<20x1xf32> to vector<20x14xf32>
    %97 = arith.mulf %93, %96 : vector<20x14xf32>
    %c0_103 = arith.constant 0 : index
    %c0_104 = arith.constant 0 : index
    %98 = vector.load %arg10[%c0_103, %c0_104] : memref<20x14xf32, #tpu.memory_space<vmem>>, vector<20x14xf32>
    %99 = arith.addf %97, %98 : vector<20x14xf32>
    %cst_105 = arith.constant 0.000000e+00 : f32
    %100 = vector.broadcast %cst_105 : f32 to vector<20x14xf32>
    %101 = arith.maximumf %99, %100 : vector<20x14xf32>
    %c0_106 = arith.constant 0 : index
    %c0_107 = arith.constant 0 : index
    %102 = vector.load %arg11[%c0_106, %c0_107] : memref<1x20xf32, #tpu.memory_space<vmem>>, vector<1x20xf32>
    %cst_108 = arith.constant dense<0.000000e+00> : vector<1x14xf32>
    %103 = tpu.matmul %102, %101, %cst_108 {dimension_numbers = #tpu.dot_dimension_numbers<[1], [0], [0], [1], [0, 0, 1, 1], [], []>} : vector<1x20xf32>, vector<20x14xf32>, vector<1x14xf32> -> vector<1x14xf32>
    %104 = vector.extract_strided_slice %103 {offsets = [0, 0], sizes = [1, 7], strides = [1, 1]} : vector<1x14xf32> to vector<1x7xf32>
    %c0_109 = arith.constant 0 : index
    %c0_110 = arith.constant 0 : index
    %105 = vector.load %arg12[%c0_109, %c0_110] : memref<7x2xf32, #tpu.memory_space<vmem>>, vector<7x2xf32>
    %cst_111 = arith.constant dense<0.000000e+00> : vector<1x2xf32>
    %106 = tpu.matmul %104, %105, %cst_111 {dimension_numbers = #tpu.dot_dimension_numbers<[1], [0], [0], [1], [0, 0, 1, 1], [], []>} : vector<1x7xf32>, vector<7x2xf32>, vector<1x2xf32> -> vector<1x2xf32>
    %c0_112 = arith.constant 0 : index
    %c0_113 = arith.constant 0 : index
    %107 = vector.load %arg13[%c0_112, %c0_113] : memref<1x2xf32, #tpu.memory_space<vmem>>, vector<1x2xf32>
    %108 = arith.addf %106, %107 : vector<1x2xf32>
    %109 = vector.extract_strided_slice %103 {offsets = [0, 7], sizes = [1, 7], strides = [1, 1]} : vector<1x14xf32> to vector<1x7xf32>
    %c0_114 = arith.constant 0 : index
    %c0_115 = arith.constant 0 : index
    %110 = vector.load %arg12[%c0_114, %c0_115] : memref<7x2xf32, #tpu.memory_space<vmem>>, vector<7x2xf32>
    %cst_116 = arith.constant dense<0.000000e+00> : vector<1x2xf32>
    %111 = tpu.matmul %109, %110, %cst_116 {dimension_numbers = #tpu.dot_dimension_numbers<[1], [0], [0], [1], [0, 0, 1, 1], [], []>} : vector<1x7xf32>, vector<7x2xf32>, vector<1x2xf32> -> vector<1x2xf32>
    %c0_117 = arith.constant 0 : index
    %c0_118 = arith.constant 0 : index
    %112 = vector.load %arg13[%c0_117, %c0_118] : memref<1x2xf32, #tpu.memory_space<vmem>>, vector<1x2xf32>
    %113 = arith.addf %111, %112 : vector<1x2xf32>
    %114 = arith.maximumf %108, %113 : vector<1x2xf32>
    %115 = arith.subf %108, %114 : vector<1x2xf32>
    %116 = math.exp %115 : vector<1x2xf32>
    %117 = arith.subf %113, %114 : vector<1x2xf32>
    %118 = math.exp %117 : vector<1x2xf32>
    %119 = arith.addf %116, %118 : vector<1x2xf32>
    %cst_119 = arith.constant 1.000000e+00 : f32
    %120 = vector.broadcast %cst_119 : f32 to vector<1x2xf32>
    %121 = arith.divf %120, %119 : vector<1x2xf32>
    %122 = arith.mulf %116, %121 : vector<1x2xf32>
    %c0_120 = arith.constant 0 : index
    %c0_121 = arith.constant 0 : index
    %123 = vector.load %arg14[%c0_120, %c0_121] : memref<2x2xf32, #tpu.memory_space<vmem>>, vector<1x2xf32>
    tpu.vector_store %arg14[%c0_120, %c0_121], %122 {strides = array<i32>} : memref<2x2xf32, #tpu.memory_space<vmem>>, vector<1x2xf32>,
    %124 = arith.mulf %118, %121 : vector<1x2xf32>
    %c1_122 = arith.constant 1 : index
    %c0_123 = arith.constant 0 : index
    %125 = vector.load %arg14[%c1_122, %c0_123] : memref<2x2xf32, #tpu.memory_space<vmem>>, vector<1x2xf32>
    tpu.vector_store %arg14[%c1_122, %c0_123], %124 {strides = array<i32>} : memref<2x2xf32, #tpu.memory_space<vmem>>, vector<1x2xf32>,
    return
  }
}

</mosaic_0001>

<bundles_post_ra>
// kernel: mul.53
= control target key start
LH: loop header
LB: loop body
LE: loop exit
PB: predicated region body
PF: predicated region fallthrough
CT: control target
= control target key end

     0   :  { %v5_v0 = vlaneseq  ;;  %s58_s0 = inlined_call_operand.vmem [shape: f32[20], index: 0, kind: input, shape index: {}]   ;;  %s59_s1 = inlined_call_operand.vmem [shape: f32[20,14], index: 1, kind: output, shape index: {}]  }
   0x1   :  { %v4_v3 = vld [vmem:[%s58_s0] ss:$0 sm:$0xff] }
   0x2   :  { %v6_v1 = vshrl.u32 %v5_v0, 7 }
   0x4   :  { %32 = vset.pattern.permute.xlu0 %v6_v1  ;;  %v24_v2 = vadd.s32 16, %v6_v1  ;;  %v15_v4 = vadd.s32 8, %v6_v1 }
   0x6   :  { %34 = vset.pattern.permute.xlu1 %v24_v2 }
   0xc   :  { %9 = vperm.xlu0 %32, %v4_v3  }
   0xe   :  { %26 = vperm.xlu1 %34, %v4_v3  }
  0x14   :  { %33 = vset.pattern.permute.xlu0 %v15_v4 }
  0x1c   :  { %17 = vperm.xlu0 %33, %v4_v3  }
  0x24   :  { %35 = vset.pattern.permute.xlu0 %v24_v2 }
  0x7e   :  { %v10_v5 = vpop.permute.xlu0 %9 }
  0x7f   :  { %11 = vst [vmem:[%s59_s1] sm:$0xff] %v10_v5 }
  0x80   :  { %v27_v6 = vpop.permute.xlu1 %26 }
  0x81   :  { %31 = vst [vmem:[%s59_s1 + $0x10] sm:$0xff] %v27_v6 }
  0x8e   :  { %v18_v7 = vpop.permute.xlu0 %17 }
  0x8f   :  { %30 = vst [vmem:[%s59_s1 + $0x8] sm:$0xff] %v18_v7 }

// kernel: testnet_forward.1
= control target key start
LH: loop header
LB: loop body
LE: loop exit
PB: predicated region body
PF: predicated region fallthrough
CT: control target
= control target key end

     0   :  { %s2300_s17 = smov 124   ;;  %vm75_vm0 = vcmask 1041408   ;;  %vm76_vm1 = vcmask 1045508   ;;  %s3045_s0 = inlined_call_operand.vmem [shape: bf16[20,292], index: 0, kind: input, shape index: {}]   ;;  %s3046_s1 = inlined_call_operand.vmem [shape: bf16[4,20,60], index: 1, kind: input, shape index: {}]   ;;  %s3047_s2 = inlined_call_operand.vmem [shape: f32[4,20,1], index: 2, kind: input, shape index: {}]   ;;  %s3048_s3 = inlined_call_operand.vmem [shape: bf16[287,148], index: 3, kind: input, shape index: {}]   ;;  %s3049_s4 = inlined_call_operand.vmem [shape: bf16[143,76], index: 4, kind: input, shape index: {}]   ;;  %s3050_s5 = inlined_call_operand.vmem [shape: bf16[71,40], index: 5, kind: input, shape index: {}]   ;;  %s3051_s6 = inlined_call_operand.vmem [shape: bf16[35,14], index: 6, kind: input, shape index: {}]   ;;  %s3052_s7 = inlined_call_operand.vmem [shape: f32[20,148], index: 7, kind: input, shape index: {}]   ;;  %s3053_s8 = inlined_call_operand.vmem [shape: f32[20,76], index: 8, kind: input, shape index: {}]   ;;  %s3054_s9 = inlined_call_operand.vmem [shape: f32[20,40], index: 9, kind: input, shape index: {}]   ;;  %s3055_s10 = inlined_call_operand.vmem [shape: f32[20,14], index: 10, kind: input, shape index: {}]   ;;  %s3056_s11 = inlined_call_operand.vmem [shape: f32[1,20], index: 11, kind: input, shape index: {}]   ;;  %s3057_s12 = inlined_call_operand.vmem [shape: f32[7,2], index: 12, kind: input, shape index: {}]   ;;  %s3058_s13 = inlined_call_operand.vmem [shape: f32[1,2], index: 13, kind: input, shape index: {}]   ;;  %s3059_s14 = inlined_call_operand.hbm [shape: f32[2,2], index: 14, kind: output, shape index: {}]  }
   0x1   :  { %v135_v0 = vld [vmem:[%s3045_s0 + $0x18] sm:$0x33]  ;;  %v133_v1 = vld [vmem:[%s3045_s0 + $0xc] sm:$0xff]  ;;  %vm2394_vm2 = vmor %vm75_vm0, %vm76_vm1 }
   0x2   :  { %151 = vrot.lane.b32.xlu1 %v135_v0, %s2300_s17  ;;  %147 = vrot.lane.b32.xlu0 %v133_v1, %s2300_s17  ;;  %v67_v2 = vld [vmem:[%s3045_s0 + $0x18] sm:$0x33]  ;;  %v81_v3 = vrot.slane %v133_v1, 6  ;;  %v131_v6 = vld [vmem:[%s3045_s0] sm:$0xff]  ;;  %58 = vst [vmem:[#allocation3 + $0xc] sm:$0xff] %v133_v1 }
   0x3   :  { %v87_v4 = vrot.slane %v67_v2, 6  ;;  %v66_v7 = vld [vmem:[%s3045_s0 + $0x14] sm:$0xf]  ;;  %55 = vst [vmem:[#allocation3] sm:$0xff] %v131_v6  ;;  %v68_v10 = vld [vmem:[%s3045_s0 + $0x20] sm:$0x3] }
   0x4   :  { %v86_v8 = vrot.slane %v81_v3, 4  ;;  %v84_v9 = vrot.slane %v66_v7, 6 }
   0x5   :  { %19 = vsyncpa [#allocation5], 0  ;;  %v136_v11 = vld [vmem:[%s3045_s0 + $0x20] sm:$0x3]  ;;  %v134_v12 = vld [vmem:[%s3045_s0 + $0x14] sm:$0xf] }
   0x6   :  { %v88_v13 = vsel %vm2394_vm2, %v86_v8, %v87_v4  ;;  %s2301_s30 = smov 126   ;;  %v89_v14 = vrot.slane %v84_v9, 4  ;;  %v90_v15 = vrot.slane %v68_v10, 6  ;;  %v132_v17 = vld [vmem:[%s3045_s0 + $0x8] sm:$0xf]  ;;  %v78_v18 = vrot.slane %v131_v6, 6 }
   0x7   :  { %100 = vrot.lane.b32.xlu2 %v88_v13, %s2301_s30  ;;  %v64_v19 = vld [vmem:[%s3045_s0 + $0x8] sm:$0xf]  ;;  %v52_v26 = vld [vmem:[%s3045_s0 + $0x14] sm:$0xf]  ;;  %vm56_vm3 = vcmask 257024   ;;  %vm61_vm4 = vcmask 254976  }
   0x8   :  { %v91_v16 = vsel %vm2394_vm2, %v89_v14, %v90_v15  ;;  %v80_v20 = vrot.slane %v78_v18, 4  ;;  %v79_v21 = vrot.slane %v64_v19, 6  ;;  %v50_v25 = vld [vmem:[%s3045_s0 + $0x8] sm:$0xf]  ;;  %59 = vst.msk [vmem:[#allocation3 + $0x14] sm:$0xf] %vm56_vm3, %v52_v26 }
   0x9   :  { %57 = vst.msk [vmem:[#allocation3 + $0x8] sm:$0xf] %vm56_vm3, %v50_v25  ;;  %v54_v27 = vld [vmem:[%s3045_s0 + $0x20] sm:$0x3]  ;;  %vm110_vm5 = vcmask 1043456   ;;  %vm112_vm6 = vcmask 1031168  }
   0xa   :  { %153 = vrot.lane.b32.xlu1 %v136_v11, %s2300_s17  ;;  %149 = vrot.lane.b32.xlu0 %v134_v12, %s2300_s17  ;;  %v82_v22 = vsel %vm2394_vm2, %v80_v20, %v81_v3  ;;  %v83_v23 = vrot.slane %v79_v21, 4  ;;  %62 = vst.msk [vmem:[#allocation3 + $0x20] sm:$0x3] %vm61_vm4, %v54_v27  ;;  %v53_v34 = vld [vmem:[%s3045_s0 + $0x18] sm:$0x33]  ;;  %vm162_vm7 = vcmask 1014784  }
   0xb   :  { %60 = vst [vmem:[#allocation3 + $0x18] sm:$0x33] %v53_v34  ;;  %vm275_vm8 = vcmask 1045504   ;;  %vm125_vm9 = vcmask 257026   ;;  %vm268_vm10 = vcmask 490496   ;;  %s2302_s28 = smov 127  }
   0xc   :  { %v85_v24 = vsel %vm2394_vm2, %v83_v23, %v84_v9  ;;  %vm618_vm11 = vcmask 1046528   ;;  %vm619_vm12 = vcmask 1047552   ;;  %vm611_vm13 = vcmask 252928   ;;  %s1739_s29 = sshll.u32 %s3059_s14, 4  ;;  %s1740_s29 = int_to_ptr.hbm [resolvable:$true] %s1739_s29 }
   0xd   :  { %vm366_vm14 = vcmask 1039360   ;;  %vm782_vm15 = vcmask 162820  }
   0xe   :  { %vm2784_vm1 = vmor %vm782_vm15, %vm110_vm5 }
   0xf   :  { %102 = vrot.lane.b32.xlu2 %v91_v16, %s2301_s30  ;;  %v2131_v26 = vld [vmem:[#allocation3 + $0x10] sm:$0xf0] }
  0x10   :  { %v1762_v25 = vld [vmem:[#allocation3 + $0x8] sm:$0xf] }
  0x12   :  { %145 = vrot.lane.b32.xlu1 %v132_v17, %s2300_s17  ;;  %143 = vrot.lane.b32.xlu0 %v131_v6, %s2300_s17 }
  0x17   :  { %92 = vrot.lane.b32.xlu2 %v78_v18, %s2301_s30 }
  0x1a   :  { %94 = vrot.lane.b32.xlu0 %v79_v21, %s2301_s30  ;;  %96 = vrot.lane.b32.xlu1 %v82_v22, %s2301_s30 }
  0x1f   :  { %98 = vrot.lane.b32.xlu2 %v85_v24, %s2301_s30 }
  0x61   :  { %v101_v28 = vpop.permute.xlu2 %100 }
  0x62   :  { %v108_v29 = vrot.slane %v101_v28, 4 }
  0x69   :  { %v103_v30 = vpop.permute.xlu2 %102 }
  0x6a   :  { %v109_v31 = vrot.slane %v103_v30, 4  ;;  %130 = vst.msk [vmem:[#allocation3 + $0x38] sm:$0xf] %vm56_vm3, %v103_v30  ;;  %v2130_v30 = vld [vmem:[#allocation3 + $0x8] sm:$0xf0] }
  0x6c   :  { %v116_v32 = vsel %vm110_vm5, %v108_v29, %v109_v31  ;;  %v1754_v29 = vld [vmem:[#allocation3] sm:$0xf] }
  0x6d   :  { %v117_v33 = vsel %vm112_vm6, %v101_v28, %v116_v32  ;;  %v1763_v28 = vor.u32 %v2131_v26, %v1762_v25  ;;  %v1848_v26 = vld [vmem:[%s3048_s3 + $0x50] sm:$0xf] }
  0x6e   :  { %129 = vst [vmem:[#allocation3 + $0x30] sm:$0xff] %v117_v33  ;;  %v2129_v33 = vld [vmem:[#allocation3 + $0x4] sm:$0xf] }
  0x71   :  { %v93_v35 = vpop.permute.xlu2 %92  ;;  %v1786_v7 = vld [vmem:[#allocation3 + $0x38] sm:$0xf] }
  0x72   :  { %v104_v9 = vrot.slane %v93_v35, 4 }
  0x74   :  { %v152_v36 = vpop.permute.xlu1 %151  ;;  %v148_v37 = vpop.permute.xlu0 %147 }
  0x75   :  { %v159_v41 = vrot.slane %v152_v36, 4  ;;  %v157_v42 = vrot.slane %v148_v37, 4  ;;  %v1778_v15 = vld [vmem:[#allocation3 + $0x30] sm:$0xf]  ;;  %v2135_v19 = vld [vmem:[#allocation3 + $0x34] sm:$0xf] }
  0x79   :  { %v99_v38 = vpop.permute.xlu2 %98 }
  0x7a   :  { %128 = vst.msk [vmem:[#allocation3 + $0x2c] sm:$0xf] %vm56_vm3, %v99_v38  ;;  %v107_v1 = vrot.slane %v99_v38, 4 }
  0x7c   :  { %v154_v39 = vpop.permute.xlu1 %153  ;;  %v150_v40 = vpop.permute.xlu0 %149 }
  0x7d   :  { %v160_v43 = vrot.slane %v154_v39, 4  ;;  %179 = vst.msk [vmem:[#allocation3 + $0x5c] sm:$0x3] %vm61_vm4, %v154_v39  ;;  %v158_v44 = vrot.slane %v150_v40, 4  ;;  %v2128_v39 = vld [vmem:[%s3046_s1] sm:$0xff] }
  0x7e   :  { %177 = vst.msk [vmem:[#allocation3 + $0x50] sm:$0xf] %vm56_vm3, %v150_v40  ;;  %v1755_v40 = vor.u32 %v2130_v30, %v1754_v29  ;;  %v1912_v29 = vld [vmem:[%s3048_s3 + $0xd0] sm:$0xf]  ;;  %v2168_v30 = vld [vmem:[%s3048_s3 + $0xd4] sm:$0xf0] }
  0x7f   :  { %v166_v45 = vsel %vm110_vm5, %v159_v41, %v160_v43  ;;  %v164_v46 = vsel %vm110_vm5, %v157_v42, %v158_v44  ;;  %v182_v42 = vld [vmem:[%s3046_s1 + $0x8] sm:$0x3] }
  0x80   :  { %v167_v47 = vsel %vm162_vm7, %v152_v36, %v166_v45  ;;  %v165_v48 = vsel %vm162_vm7, %v148_v37, %v164_v46  ;;  %v1756_v36 = vld [vmem:[#allocation3 + $0xc] sm:$0xf0]  ;;  %v204_v43 = vunpack.c.l.b16 %v182_v42  ;;  %v1864_v45 = vld [vmem:[%s3048_s3 + $0x70] sm:$0xf]  ;;  %v2156_v46 = vld [vmem:[%s3048_s3 + $0x74] sm:$0xf0] }
  0x81   :  { %178 = vst [vmem:[#allocation3 + $0x54] sm:$0x33] %v167_v47  ;;  %v2134_v23 = vld [vmem:[#allocation3 + $0x28] sm:$0xf0]  ;;  %v1759_v41 = vor.u32 %v2129_v33, %v1756_v36  ;;  %v1928_v47 = vld [vmem:[%s3048_s3 + $0xf0] sm:$0xf] }
  0x82   :  { %176 = vst [vmem:[#allocation3 + $0x48] sm:$0xff] %v165_v48  ;;  %v206_v44 = vpack.c.b16 %v204_v43, %v204_v43  ;;  %v1865_v48 = vor.u32 %v2156_v46, %v1864_v45  ;;  %v1850_v33 = vld [vmem:[%s3048_s3 + $0x58] sm:$0xf0]  ;;  %v2150_v36 = vld [vmem:[%s3048_s3 + $0x44] sm:$0xf0] }
  0x83   :  { %v1842_v42 = vld [vmem:[%s3048_s3 + $0x48] sm:$0xf0]  ;;  %v2148_v45 = vld [vmem:[%s3048_s3 + $0x34] sm:$0xf0]  ;;  %v1896_v46 = vld [vmem:[%s3048_s3 + $0xb0] sm:$0xf] }
  0x84   :  { %v146_v49 = vpop.permute.xlu1 %145  ;;  %v144_v50 = vpop.permute.xlu0 %143  ;;  %v2140_v51 = vld [vmem:[#allocation3 + $0x58] sm:$0x30]  ;;  %628 = vmatpush.bf16.msra.mxu3 %v1865_v48  ;;  %v2164_v48 = vld [vmem:[%s3048_s3 + $0xb4] sm:$0xf0] }
  0x85   :  { %v156_v52 = vrot.slane %v146_v49, 4  ;;  %175 = vst.msk [vmem:[#allocation3 + $0x44] sm:$0xf] %vm56_vm3, %v146_v49  ;;  %v155_v53 = vrot.slane %v144_v50, 4  ;;  %v1798_v54 = vld [vmem:[#allocation3 + $0x50] sm:$0xf] }
  0x86   :  { %v1799_v55 = vor.u32 %v2140_v51, %v1798_v54  ;;  %v2172_v49 = vld [vmem:[%s3048_s3 + $0xf4] sm:$0xf0]  ;;  %v1866_v51 = vld [vmem:[%s3048_s3 + $0x78] sm:$0xf0]  ;;  %vm793_vm3 = vcmask 130052  }
  0x87   :  { %v161_v56 = vsel %vm110_vm5, %v155_v53, %v156_v52  ;;  %v1929_v52 = vor.u32 %v2172_v49, %v1928_v47  ;;  %v2147_v49 = vld [vmem:[%s3048_s3 + $0x34] sm:$0xf]  ;;  %vm2797_vm4 = vmor %vm793_vm3, %vm110_vm5  ;;  %vm829_vm3 = vcmask 130054  }
  0x88   :  { %v163_v57 = vsel %vm162_vm7, %v144_v50, %v161_v56  ;;  %v283_v58 = vsel %vm275_vm8, %v1799_v55, 0  ;;  %v2139_v59 = vld [vmem:[#allocation3 + $0x50] sm:$0x30]  ;;  %v1792_v60 = vld [vmem:[#allocation3 + $0x54] sm:$0x30] }
  0x89   :  { %174 = vst [vmem:[#allocation3 + $0x3c] sm:$0xff] %v163_v57  ;;  %325 = vmatpush.bf16.msra.mxu2 %v283_v58  ;;  %v1790_v61 = vld [vmem:[#allocation3 + $0x48] sm:$0xf]  ;;  %v2138_v62 = vld [vmem:[#allocation3 + $0x4c] sm:$0xf] }
  0x8a   :  { %v1791_v63 = vor.u32 %v2139_v59, %v1790_v61  ;;  %v1795_v0 = vor.u32 %v2138_v62, %v1792_v60  ;;  %v2155_v50 = vld [vmem:[%s3048_s3 + $0x74] sm:$0xf] }
  0x8b   :  { %v1869_v53 = vor.u32 %v2155_v50, %v1866_v51  ;;  %v1834_v50 = vld [vmem:[%s3048_s3 + $0x38] sm:$0xf0]  ;;  %v1897_v51 = vor.u32 %v2164_v48, %v1896_v46  ;;  %v2163_v48 = vld [vmem:[%s3048_s3 + $0xb4] sm:$0xf] }
  0x8c   :  { %v277_v2 = vsel %vm275_vm8, %v1791_v63, 0  ;;  %v280_v3 = vsel %vm275_vm8, %v1795_v0, 0  ;;  %v95_v4 = vpop.permute.xlu0 %94  ;;  %v97_v6 = vpop.permute.xlu1 %96  ;;  %v2137_v8 = vld [vmem:[#allocation3 + $0x40] sm:$0xf0] }
  0x8d   :  { %289 = vmatpush.bf16.msra.mxu0 %v277_v2  ;;  %307 = vmatpush.bf16.msra.mxu1 %v280_v3  ;;  %v105_v10 = vrot.slane %v95_v4, 4  ;;  %126 = vst.msk [vmem:[#allocation3 + $0x20] sm:$0xc] %vm125_vm9, %v95_v4  ;;  %v106_v11 = vrot.slane %v97_v6, 4  ;;  %v1787_v12 = vor.u32 %v2137_v8, %v1786_v7  ;;  %v1944_v7 = vld [vmem:[%s3048_s3 + $0x110] sm:$0xf] }
  0x8e   :  { %v2176_v8 = vld [vmem:[%s3048_s3 + $0x114] sm:$0xf0]  ;;  %vm787_vm9 = vcmask 160772  }
  0x8f   :  { %v111_v13 = vsel %vm110_vm5, %v104_v9, %v105_v10  ;;  %v114_v14 = vsel %vm110_vm5, %v106_v11, %v107_v1  ;;  %326 = vmatpush.bf16.msra.mxu2 %v1787_v12  ;;  %v1945_v9 = vor.u32 %v2176_v8, %v1944_v7  ;;  %v2303_v10 = vmov 65535   ;;  %v2175_v8 = vld [vmem:[%s3048_s3 + $0x114] sm:$0xf] }
  0x90   :  { %v113_v16 = vsel %vm112_vm6, %v93_v35, %v111_v13  ;;  %v115_v17 = vsel %vm112_vm6, %v97_v6, %v114_v14  ;;  %v2136_v18 = vld [vmem:[#allocation3 + $0x38] sm:$0xf0]  ;;  %v1780_v20 = vld [vmem:[#allocation3 + $0x3c] sm:$0xf0]  ;;  %v620_v11 = vsel %vm618_vm11, 4294967295, %v2303_v10 }
  0x91   :  { %124 = vst [vmem:[#allocation3 + $0x18] sm:$0xcc] %v113_v16  ;;  %v1779_v21 = vor.u32 %v2136_v18, %v1778_v15  ;;  %v1783_v22 = vor.u32 %v2135_v19, %v1780_v20  ;;  %v2542_v12 = vsel %vm619_vm12, %v620_v11, 0  ;;  %v1856_v14 = vld [vmem:[%s3048_s3 + $0x60] sm:$0xf]  ;;  %vm788_vm12 = vmor %vm787_vm9, %vm75_vm0 }
  0x92   :  { %127 = vst [vmem:[#allocation3 + $0x24] sm:$0xff] %v115_v17  ;;  %v623_v13 = vand.u32 %v1945_v9, %v2542_v12  ;;  %v2154_v15 = vld [vmem:[%s3048_s3 + $0x64] sm:$0xf0]  ;;  %v1920_v16 = vld [vmem:[%s3048_s3 + $0xe0] sm:$0xf] }
  0x93   :  { %290 = vmatpush.bf16.msra.mxu0 %v1779_v21  ;;  %308 = vmatpush.bf16.msra.mxu1 %v1783_v22  ;;  %v1857_v17 = vor.u32 %v2154_v15, %v1856_v14  ;;  %v2170_v18 = vld [vmem:[%s3048_s3 + $0xe4] sm:$0xf0]  ;;  %v2153_v19 = vld [vmem:[%s3048_s3 + $0x64] sm:$0xf]  ;;  %v1858_v20 = vld [vmem:[%s3048_s3 + $0x68] sm:$0xf0] }
  0x94   :  { %v1774_v24 = vld [vmem:[#allocation3 + $0x20] sm:$0xf]  ;;  %v1921_v21 = vor.u32 %v2170_v18, %v1920_v16  ;;  %v1861_v22 = vor.u32 %v2153_v19, %v1858_v20  ;;  %v1946_v9 = vld [vmem:[%s3048_s3 + $0x118] sm:$0xf0]  ;;  %v1816_v11 = vld [vmem:[%s3048_s3 + $0x10] sm:$0xf] }
  0x95   :  { %v1775_v27 = vor.u32 %v2134_v23, %v1774_v24  ;;  %v1936_v23 = vld [vmem:[%s3048_s3 + $0x100] sm:$0xf]  ;;  %v2174_v24 = vld [vmem:[%s3048_s3 + $0x104] sm:$0xf0]  ;;  %629 = vmatpush.bf16.msra.mxu3 %v1857_v17  ;;  %v1880_v14 = vld [vmem:[%s3048_s3 + $0x90] sm:$0xf]  ;;  %v1949_v19 = vor.u32 %v2175_v8, %v1946_v9 }
  0x96   :  { %v1937_v25 = vor.u32 %v2174_v24, %v1936_v23  ;;  %v2160_v16 = vld [vmem:[%s3048_s3 + $0x94] sm:$0xf0]  ;;  %v2143_v17 = vld [vmem:[%s3048_s3 + $0x14] sm:$0xf]  ;;  %v1818_v18 = vld [vmem:[%s3048_s3 + $0x18] sm:$0xf0] }
  0x97   :  { %327 = vmatpush.bf16.msra.mxu2 %v1775_v27  ;;  %v2152_v27 = vld [vmem:[%s3048_s3 + $0x54] sm:$0xf0]  ;;  %v1881_v20 = vor.u32 %v2160_v16, %v1880_v14  ;;  %v2142_v23 = vld [vmem:[%s3048_s3 + $0x4] sm:$0xf0]  ;;  %v1872_v24 = vld [vmem:[%s3048_s3 + $0x80] sm:$0xf] }
  0x98   :  { %v1766_v31 = vld [vmem:[#allocation3 + $0x18] sm:$0xf]  ;;  %v2132_v32 = vld [vmem:[#allocation3 + $0x1c] sm:$0xf]  ;;  %v1874_v14 = vld [vmem:[%s3048_s3 + $0x88] sm:$0xf0] }
  0x99   :  { %v2133_v34 = vld [vmem:[#allocation3 + $0x20] sm:$0xf0]  ;;  %v1768_v35 = vld [vmem:[#allocation3 + $0x24] sm:$0xf0] }
  0x9a   :  { %v1767_v37 = vor.u32 %v2133_v34, %v1766_v31  ;;  %v1771_v38 = vor.u32 %v2132_v32, %v1768_v35  ;;  %v1913_v31 = vor.u32 %v2168_v30, %v1912_v29  ;;  %v2151_v32 = vld [vmem:[%s3048_s3 + $0x54] sm:$0xf]  ;;  %v1840_v34 = vld [vmem:[%s3048_s3 + $0x40] sm:$0xf]  ;;  %v626_v29 = vand.u32 %v1949_v19, %v2542_v12 }
  0x9b   :  { %328 = vmatpush.bf16.msra.mxu2 %v1763_v28  ;;  %v1849_v28 = vor.u32 %v2152_v27, %v1848_v26  ;;  %v1853_v35 = vor.u32 %v2151_v32, %v1850_v33  ;;  %v2158_v26 = vld [vmem:[%s3048_s3 + $0x84] sm:$0xf0]  ;;  %v2141_v27 = vld [vmem:[%s3048_s3 + $0x4] sm:$0xf]  ;;  %v2171_v32 = vld [vmem:[%s3048_s3 + $0xf4] sm:$0xf] }
  0x9c   :  { %291 = vmatpush.bf16.msra.mxu0 %v1767_v37  ;;  %309 = vmatpush.bf16.msra.mxu1 %v1771_v38  ;;  %v1904_v37 = vld [vmem:[%s3048_s3 + $0xc0] sm:$0xf]  ;;  %v2166_v38 = vld [vmem:[%s3048_s3 + $0xc4] sm:$0xf0]  ;;  %v1873_v30 = vor.u32 %v2158_v26, %v1872_v24  ;;  %v1930_v33 = vld [vmem:[%s3048_s3 + $0xf8] sm:$0xf0] }
  0x9d   :  { %630 = vmatpush.bf16.msra.mxu3 %v1849_v28  ;;  %v1810_v28 = vld [vmem:[%s3048_s3 + $0x8] sm:$0xf0]  ;;  %v2194_v16 = vld [vmem:[%s3049_s4 + $0x40] sm:$0xff] }
  0x9e   :  { %1804 = vmatmul.msk.bf16.vlgmr.msra.gmra.mxu2 %vm268_vm10, %v2128_v39 }
  0x9f   :  { %682 = vmatpush.bf16.msrb.mxu2 %v1869_v53  ;;  %v1824_v53 = vld [vmem:[%s3048_s3 + $0x20] sm:$0xf] }
  0xa0   :  { %292 = vmatpush.bf16.msra.mxu0 %v1755_v40  ;;  %310 = vmatpush.bf16.msra.mxu1 %v1759_v41  ;;  %v1905_v40 = vor.u32 %v2166_v38, %v1904_v37  ;;  %v2149_v41 = vld [vmem:[%s3048_s3 + $0x44] sm:$0xf] }
  0xa1   :  { %v1845_v43 = vor.u32 %v2149_v41, %v1842_v42  ;;  %v2169_v38 = vld [vmem:[%s3048_s3 + $0xe4] sm:$0xf] }
  0xa3   :  { %1800 = vmatmul.msk.bf16.vlgmr.msra.gmra.mxu0 %vm268_vm10, %v2128_v39  ;;  %1802 = vmatmul.msk.bf16.vlgmr.msra.gmra.mxu1 %vm268_vm10, %v2128_v39  ;;  %v1841_v39 = vor.u32 %v2150_v36, %v1840_v34  ;;  %v1933_v34 = vor.u32 %v2171_v32, %v1930_v33 }
  0xa4   :  { %646 = vmatpush.bf16.msrb.mxu0 %v1929_v52  ;;  %670 = vmatpush.bf16.msrb.mxu1 %v623_v13  ;;  %v1837_v52 = vor.u32 %v2147_v49, %v1834_v50  ;;  %v2144_v13 = vld [vmem:[%s3048_s3 + $0x14] sm:$0xf0]  ;;  %v1898_v49 = vld [vmem:[%s3048_s3 + $0xb8] sm:$0xf0] }
  0xa5   :  { %683 = vmatpush.bf16.msrb.mxu2 %v1861_v22  ;;  %631 = vmatpush.bf16.msra.mxu3 %v1841_v39  ;;  %v1817_v15 = vor.u32 %v2144_v13, %v1816_v11  ;;  %v1808_v22 = vld [vmem:[%s3048_s3] sm:$0xf]  ;;  %v1922_v39 = vld [vmem:[%s3048_s3 + $0xe8] sm:$0xf0]  ;;  %v1901_v50 = vor.u32 %v2163_v48, %v1898_v49  ;;  %v2157_v13 = vld [vmem:[%s3048_s3 + $0x84] sm:$0xf] }
  0xa6   :  { %v1925_v42 = vor.u32 %v2169_v38, %v1922_v39  ;;  %v737_v38 = vld [vmem:[%s3047_s2 + $0x8] sm:$0xff] }
  0xa8   :  { %647 = vmatpush.bf16.msrb.mxu0 %v1921_v21  ;;  %671 = vmatpush.bf16.msrb.mxu1 %v1937_v25  ;;  %v1821_v21 = vor.u32 %v2143_v17, %v1818_v18  ;;  %v1809_v25 = vor.u32 %v2142_v23, %v1808_v22 }
  0xa9   :  { %684 = vmatpush.bf16.msrb.mxu2 %v1853_v35 }
  0xac   :  { %648 = vmatpush.bf16.msrb.mxu0 %v1913_v31  ;;  %v1813_v31 = vor.u32 %v2141_v27, %v1810_v28  ;;  %v1080_v28 = vand.u32 %v2194_v16, %v2542_v12 }
  0xad   :  { %685 = vmatpush.bf16.msrb.mxu2 %v1845_v43  ;;  %v2167_v43 = vld [vmem:[%s3048_s3 + $0xd4] sm:$0xf] }
  0xae   :  { %1805 = vmatmul.msk.bf16.gmra.mxu2 %vm268_vm10, %v206_v44 }
  0xb0   :  { %649 = vmatpush.bf16.msrb.mxu0 %v1905_v40 }
  0xb1   :  { %686 = vmatpush.bf16.msrb.mxu2 %v1837_v52  ;;  %v1890_v52 = vld [vmem:[%s3048_s3 + $0xa8] sm:$0xf0] }
  0xb3   :  { %1801 = vmatmul.msk.bf16.gmra.mxu0 %vm268_vm10, %v206_v44  ;;  %1803 = vmatmul.msk.bf16.gmra.mxu1 %vm268_vm10, %v206_v44  ;;  %v1832_v44 = vld [vmem:[%s3048_s3 + $0x30] sm:$0xf] }
  0xb4   :  { %v1833_v47 = vor.u32 %v2148_v45, %v1832_v44  ;;  %650 = vmatpush.bf16.msrb.mxu0 %v1897_v51  ;;  %v1914_v44 = vld [vmem:[%s3048_s3 + $0xd8] sm:$0xf0]  ;;  %v2161_v51 = vld [vmem:[%s3048_s3 + $0xa4] sm:$0xf] }
  0xb5   :  { %v1917_v46 = vor.u32 %v2167_v43, %v1914_v44 }
  0xb6   :  { %632 = vmatpush.bf16.msra.mxu3 %v1833_v47 }
 0x120   :  { %v2502_v54 = vpop.f32.mrf.mxu0  ;;  %v2504_v55 = vpop.f32.mrf.mxu1 }
 0x121   :  { %v2220_v56 = vpack.i.bf16 %v2504_v55, %v2502_v54  ;;  %v2508_v57 = vpop.f32.mrf.mxu2 }
 0x123   :  { %2221 = vrot.lane.b32.xlu0 %v2220_v56, %s2302_s28  ;;  %v2146_v56 = vld [vmem:[%s3048_s3 + $0x24] sm:$0xf0] }
 0x128   :  { %v2511_v58 = vpop.f32.mrf.mxu0  ;;  %v2513_v59 = vpop.f32.mrf.mxu1 }
 0x129   :  { %v2225_v60 = vpack.i.bf16 %v2513_v59, %v2511_v58  ;;  %v2517_v61 = vpop.f32.mrf.mxu2 }
 0x12a   :  { %v2230_v62 = vpack.i.bf16 %v2517_v61, %v2508_v57 }
 0x12b   :  { %2226 = vrot.lane.b32.xlu1 %v2225_v60, %s2302_s28  ;;  %v1888_v60 = vld [vmem:[%s3048_s3 + $0xa0] sm:$0xf] }
 0x12c   :  { %2231 = vrot.lane.b32.xlu2 %v2230_v62, %s2302_s28  ;;  %v1825_v62 = vor.u32 %v2146_v56, %v1824_v53  ;;  %v736_v53 = vld [vmem:[%s3047_s2] sm:$0xff] }
 0x12e   :  { %633 = vmatpush.bf16.msra.mxu3 %v1825_v62  ;;  %v1893_v62 = vor.u32 %v2161_v51, %v1890_v52 }
 0x130   :  { %v2523_v63 = vpop.f32.mrf.mxu0  ;;  %v2525_v0 = vpop.f32.mrf.mxu1 }
 0x131   :  { %v2235_v1 = vpack.i.bf16 %v2525_v0, %v2523_v63  ;;  %v2529_v2 = vpop.f32.mrf.mxu2 }
 0x132   :  { %634 = vmatpush.bf16.msra.mxu3 %v1817_v15 }
 0x133   :  { %364 = vrot.lane.b32.xlu1 %v2529_v2, %s2302_s28  ;;  %2236 = vrot.lane.b32.xlu0 %v2235_v1, %s2302_s28  ;;  %v2162_v1 = vld [vmem:[%s3048_s3 + $0xa4] sm:$0xf0] }
 0x136   :  { %635 = vmatpush.bf16.msra.mxu3 %v1809_v25 }
 0x138   :  { %v301_v3 = vpop.f32.mrf.mxu0  ;;  %v319_v4 = vpop.f32.mrf.mxu1 }
 0x139   :  { %v337_v6 = vpop.f32.mrf.mxu2  ;;  %v2145_v3 = vld [vmem:[%s3048_s3 + $0x24] sm:$0xf]  ;;  %v1826_v4 = vld [vmem:[%s3048_s3 + $0x28] sm:$0xf0] }
 0x13a   :  { %v1889_v6 = vor.u32 %v2162_v1, %v1888_v60  ;;  %v1829_v7 = vor.u32 %v2145_v3, %v1826_v4  ;;  %700 = vmatpush.bf16.msrb.mxu3 %v1933_v34  ;;  %v2304_v60 = vmov 0   ;;  %v2159_v1 = vld [vmem:[%s3048_s3 + $0x94] sm:$0xf]  ;;  %v1882_v3 = vld [vmem:[%s3048_s3 + $0x98] sm:$0xf0] }
 0x13b   :  { %2242 = vset.pattern.permute.xlu1 %v2304_v60  ;;  %v2173_v4 = vld [vmem:[%s3048_s3 + $0x104] sm:$0xf]  ;;  %2241 = vset.pattern.permute.xlu0 %v2304_v60  ;;  %v1885_v11 = vor.u32 %v2159_v1, %v1882_v3 }
 0x13c   :  { %651 = vmatpush.bf16.msrb.mxu0 %v1889_v6  ;;  %687 = vmatpush.bf16.msrb.mxu2 %v1829_v7  ;;  %v1938_v6 = vld [vmem:[%s3048_s3 + $0x108] sm:$0xf0]  ;;  %v760_v1 = vld [vmem:[%s3052_s7] sm:$0xff] }
 0x13d   :  { %741 = vperm.xlu1 %2242, %v736_v53   ;;  %v1941_v7 = vor.u32 %v2173_v4, %v1938_v6  ;;  %2240 = vset.pattern.permute.xlu2 %v2304_v60 }
 0x13e   :  { %701 = vmatpush.bf16.msrb.mxu3 %v1925_v42  ;;  %746 = vperm.xlu2 %2240, %v737_v38  }
 0x140   :  { %652 = vmatpush.bf16.msrb.mxu0 %v1881_v20  ;;  %688 = vmatpush.bf16.msrb.mxu2 %v1821_v21  ;;  %v1877_v21 = vor.u32 %v2157_v13, %v1874_v14 }
 0x142   :  { %702 = vmatpush.bf16.msrb.mxu3 %v1917_v46 }
 0x144   :  { %653 = vmatpush.bf16.msrb.mxu0 %v1873_v30  ;;  %689 = vmatpush.bf16.msrb.mxu2 %v1813_v31 }
 0x148   :  { %724 = vmatpush.bf16.msra.mxu0 %v626_v29  ;;  %2211 = vmatpush.bf16.msra.mxu2 %v626_v29 }
 0x14c   :  { %725 = vmatpush.bf16.msra.mxu0 %v1941_v7  ;;  %2212 = vmatpush.bf16.msra.mxu2 %v1941_v7 }
 0x186   :  { %v2232_v35 = vpop.permute.xlu2 %2231 }
 0x187   :  { %v2234_v36 = vunpack.i.h.bf16 %v2232_v35  ;;  %v2233_v37 = vunpack.i.l.bf16 %v2232_v35 }
 0x189   :  { %v387_v40 = vmax.f32 %v2517_v61, %v2234_v36  ;;  %v384_v41 = vmax.f32 %v2508_v57, %v2233_v37  ;;  %v2165_v61 = vld [vmem:[%s3048_s3 + $0xc4] sm:$0xf]  ;;  %v1906_v57 = vld [vmem:[%s3048_s3 + $0xc8] sm:$0xf0] }
 0x18a   :  { %v1909_v47 = vor.u32 %v2165_v61, %v1906_v57 }
 0x18b   :  { %v2704_v45 = vpack.c.bf16 %v387_v40, %v384_v41 }
 0x18c   :  { %703 = vmatpush.bf16.msrb.mxu3 %v1909_v47 }
 0x18d   :  { %1950 = vmatmul.msk.bf16.vlgmr.msrb.gmra.mxu1 %vm611_vm13, %v2704_v45 }
 0x190   :  { %704 = vmatpush.bf16.msrb.mxu3 %v1901_v50 }
 0x194   :  { %705 = vmatpush.bf16.msrb.mxu3 %v1893_v62 }
 0x195   :  { %v2222_v56 = vpop.permute.xlu0 %2221 }
 0x196   :  { %v2224_v8 = vunpack.i.h.bf16 %v2222_v56  ;;  %v2223_v9 = vunpack.i.l.bf16 %v2222_v56 }
 0x198   :  { %v368_v17 = vsel %vm366_vm14, %v2224_v8, %v2233_v37  ;;  %v367_v20 = vsel %vm366_vm14, %v2223_v9, %v2224_v8  ;;  %706 = vmatpush.bf16.msrb.mxu3 %v1885_v11  ;;  %v761_v9 = vld [vmem:[%s3052_s7 + $0x8] sm:$0xff]  ;;  %v747_v14 = vpop.permute.xlu2 %746 }
 0x199   :  { %v382_v24 = vmax.f32 %v2502_v54, %v367_v20  ;;  %v383_v26 = vmax.f32 %v2504_v55, %v368_v17  ;;  %v738_v54 = vld [vmem:[%s3047_s2 + $0x10] sm:$0xf] }
 0x19a   :  { %751 = vperm.xlu0 %2241, %v738_v54  }
 0x19c   :  { %707 = vmatpush.bf16.msrb.mxu3 %v1877_v21 }
 0x19d   :  { %v2227_v15 = vpop.permute.xlu1 %2226 }
 0x19e   :  { %v2229_v18 = vunpack.i.h.bf16 %v2227_v15  ;;  %v2228_v19 = vunpack.i.l.bf16 %v2227_v15 }
 0x1a0   :  { %v370_v22 = vsel %vm366_vm14, %v2229_v18, %v2234_v36  ;;  %v369_v23 = vsel %vm366_vm14, %v2228_v19, %v2229_v18 }
 0x1a1   :  { %v385_v25 = vmax.f32 %v2511_v58, %v369_v23  ;;  %v386_v27 = vmax.f32 %v2513_v59, %v370_v22  ;;  %v762_v23 = vld [vmem:[%s3052_s7 + $0x10] sm:$0xff] }
 0x1a3   :  { %v391_v29 = vpack.c.bf16 %v385_v25, %v382_v24  ;;  %v392_v30 = vpack.c.bf16 %v386_v27, %v383_v26 }
 0x1a5   :  { %v365_v31 = vpop.permute.xlu1 %364  ;;  %636 = vmatmul.bf16.vlgmr.msra.gmra.mxu3 %v391_v29  ;;  %654 = vmatmul.bf16.vlgmr.msrb.gmra.mxu0 %v392_v30  ;;  %v2237_v32 = vpop.permute.xlu0 %2236 }
 0x1a6   :  { %v390_v33 = vmax.f32 %v2529_v2, %v365_v31  ;;  %690 = vmatmul.bf16.vlgmr.msrb.gmra.mxu2 %v391_v29  ;;  %1107 = vmatpush.bf16.msrb.mxu0 %v1080_v28  ;;  %v2239_v58 = vunpack.i.h.bf16 %v2237_v32  ;;  %v2238_v59 = vunpack.i.l.bf16 %v2237_v32  ;;  %v763_v28 = vld [vmem:[%s3052_s7 + $0x18] sm:$0xff] }
 0x1a8   :  { %v396_v55 = vpack.c.bf16 %v390_v33, %v390_v33  ;;  %v371_v12 = vsel %vm366_vm14, %v2238_v59, %v2239_v58  ;;  %v372_v34 = vsel %vm366_vm14, %v2239_v58, %v365_v31 }
 0x1a9   :  { %v388_v35 = vmax.f32 %v2523_v63, %v371_v12  ;;  %v389_v2 = vmax.f32 %v2525_v0, %v372_v34  ;;  %v764_v34 = vld [vmem:[%s3052_s7 + $0x20] sm:$0xf] }
 0x1aa   :  { %1951 = vmatmul.msk.bf16.gmra.mxu1 %vm611_vm13, %v396_v55 }
 0x1ab   :  { %v394_v36 = vpack.c.bf16 %v388_v35, %v388_v35  ;;  %v395_v37 = vpack.c.bf16 %v389_v2, %v389_v2 }
 0x1af   :  { %v742_v53 = vpop.permute.xlu1 %741 }
 0x1b5   :  { %641 = vmatmul.bf16.gmra.mxu3 %v394_v36  ;;  %659 = vmatmul.bf16.gmra.mxu0 %v395_v37 }
 0x1b6   :  { %695 = vmatmul.bf16.gmra.mxu2 %v394_v36 }
 0x1c5   :  { %708 = vmatmul.bf16.vlgmr.msrb.gmra.mxu3 %v392_v30  ;;  %1952 = vmatmul.msk.bf16.vlgmr.msra.gmra.mxu0 %vm611_vm13, %v2704_v45 }
 0x1c6   :  { %1953 = vmatmul.msk.bf16.vlgmr.msra.gmra.mxu2 %vm611_vm13, %v396_v55  ;;  %vm797_vm13 = vcmask 128004  }
 0x1c7   :  { %vm2814_vm15 = vmor %vm797_vm13, %vm75_vm0  ;;  %vm1187_vm13 = vcmask 584706  }
 0x1d5   :  { %713 = vmatmul.bf16.gmra.mxu3 %v395_v37  ;;  %v765_v37 = vld [vmem:[%s3052_s7 + $0x28] sm:$0xf] }
 0x20a   :  { %v673_v63 = vpop.f32.mrf.mxu1 }
 0x20c   :  { %v752_v32 = vpop.permute.xlu0 %751 }
 0x212   :  { %v675_v39 = vpop.f32.mrf.mxu1 }
 0x222   :  { %v655_v0 = vpop.f32.mrf.mxu0 }
 0x227   :  { %v678_v40 = vpop.f32.mrf.mxu1 }
 0x228   :  { %v637_v41 = vpop.f32.mrf.mxu3 }
 0x229   :  { %v691_v42 = vpop.f32.mrf.mxu2  ;;  %v656_v50 = vadd.f32 %v655_v0, %v637_v41 }
 0x22a   :  { %v657_v43 = vpop.f32.mrf.mxu0 }
 0x22b   :  { %v674_v52 = vadd.f32 %v673_v63, %v656_v50 }
 0x22d   :  { %v754_v56 = vmul.f32 %v742_v53, %v674_v52 }
 0x22f   :  { %v680_v44 = vpop.f32.mrf.mxu1  ;;  %v766_v8 = vadd.f32 %v760_v1, %v754_v56 }
 0x230   :  { %v639_v46 = vpop.f32.mrf.mxu3 }
 0x231   :  { %v693_v61 = vpop.f32.mrf.mxu2  ;;  %v658_v3 = vadd.f32 %v657_v43, %v639_v46  ;;  %v772_v16 = vmax.f32 %v766_v8, 0.0 }
 0x232   :  { %v660_v57 = vpop.f32.mrf.mxu0 }
 0x233   :  { %v676_v11 = vadd.f32 %v675_v39, %v658_v3 }
 0x235   :  { %v756_v18 = vmul.f32 %v747_v14, %v676_v11 }
 0x237   :  { %v768_v29 = vadd.f32 %v762_v23, %v756_v18 }
 0x238   :  { %v642_v47 = vpop.f32.mrf.mxu3 }
 0x239   :  { %v696_v48 = vpop.f32.mrf.mxu2  ;;  %v661_v19 = vadd.f32 %v660_v57, %v642_v47  ;;  %v774_v55 = vmax.f32 %v768_v29, 0.0 }
 0x23a   :  { %v662_v49 = vpop.f32.mrf.mxu0 }
 0x23b   :  { %v679_v30 = vadd.f32 %v678_v40, %v661_v19 }
 0x23d   :  { %v758_v58 = vmul.f32 %v752_v32, %v679_v30 }
 0x23f   :  { %v770_v63 = vadd.f32 %v764_v34, %v758_v58 }
 0x240   :  { %v644_v51 = vpop.f32.mrf.mxu3 }
 0x241   :  { %v698_v45 = vpop.f32.mrf.mxu2  ;;  %v776_v41 = vmax.f32 %v770_v63, 0.0 }
 0x242   :  { %v727_v60 = vpop.f32.mrf.mxu0 }
 0x248   :  { %v709_v62 = vpop.f32.mrf.mxu3 }
 0x249   :  { %v710_v4 = vadd.f32 %v709_v62, %v691_v42  ;;  %v732_v6 = vpop.f32.mrf.mxu2 }
 0x24a   :  { %v729_v25 = vpop.f32.mrf.mxu0 }
 0x24b   :  { %v728_v7 = vadd.f32 %v727_v60, %v710_v4 }
 0x24d   :  { %v755_v13 = vmul.f32 %v742_v53, %v728_v7 }
 0x24f   :  { %v767_v15 = vadd.f32 %v761_v9, %v755_v13 }
 0x250   :  { %v711_v17 = vpop.f32.mrf.mxu3 }
 0x251   :  { %v773_v20 = vmax.f32 %v767_v15, 0.0  ;;  %v712_v21 = vadd.f32 %v711_v17, %v693_v61  ;;  %v734_v22 = vpop.f32.mrf.mxu2 }
 0x253   :  { %v778_v26 = vpack.c.bf16 %v773_v20, %v772_v16  ;;  %v730_v27 = vadd.f32 %v729_v25, %v712_v21 }
 0x255   :  { %784 = vst.msk [vmem:[#allocation2] sm:$0xff] %vm2784_vm1, %v778_v26  ;;  %v757_v31 = vmul.f32 %v747_v14, %v730_v27 }
 0x257   :  { %v769_v33 = vadd.f32 %v763_v28, %v757_v31 }
 0x258   :  { %v714_v54 = vpop.f32.mrf.mxu3 }
 0x259   :  { %v775_v59 = vmax.f32 %v769_v33, 0.0  ;;  %v715_v12 = vadd.f32 %v714_v54, %v696_v48 }
 0x25b   :  { %v779_v35 = vpack.c.bf16 %v775_v59, %v774_v55  ;;  %v733_v2 = vadd.f32 %v732_v6, %v715_v12 }
 0x25c   :  { %v834_v38 = vld [vmem:[#allocation2] sm:$0xff] }
 0x25d   :  { %785 = vst.msk [vmem:[#allocation2 + $0x8] sm:$0xff] %vm2784_vm1, %v779_v35  ;;  %v759_v39 = vmul.f32 %v752_v32, %v733_v2  ;;  %840 = vrot.lane.b32.xlu0 %v834_v38, %s2300_s17  ;;  %v806_v45 = vrot.slane %v834_v38, 6  ;;  %vm828_vm1 = vcmask 1043458  }
 0x25e   :  { %795 = vst.msk [vmem:[#allocation3] sm:$0xff] %vm2797_vm4, %v834_v38  ;;  %vm830_vm9 = vmor %vm829_vm3, %vm828_vm1  ;;  %vm1332_vm1 = vcmask 580608   ;;  %vm1397_vm3 = vcmask 322560  }
 0x25f   :  { %v771_v0 = vadd.f32 %v765_v37, %v759_v39  ;;  %v807_v52 = vrot.slane %v806_v45, 4  ;;  %v2177_v39 = vld [vmem:[%s3046_s1 + $0xc] sm:$0xff] }
 0x260   :  { %v716_v40 = vpop.f32.mrf.mxu3 }
 0x261   :  { %v777_v42 = vmax.f32 %v771_v0, 0.0  ;;  %v1956_v0 = vld [vmem:[%s3046_s1 + $0x14] sm:$0x3] }
 0x262   :  { %v875_v40 = vunpack.c.l.b16 %v1956_v0 }
 0x263   :  { %v780_v43 = vpack.c.bf16 %v777_v42, %v776_v41 }
 0x264   :  { %v835_v44 = vld [vmem:[#allocation2 + $0x8] sm:$0xff]  ;;  %v877_v41 = vpack.c.b16 %v875_v40, %v875_v40 }
 0x265   :  { %789 = vst.msk [vmem:[#allocation2 + $0x10] sm:$0x33] %vm788_vm12, %v780_v43  ;;  %842 = vrot.lane.b32.xlu2 %v835_v44, %s2300_s17  ;;  %v808_v46 = vrot.slane %v835_v44, 6  ;;  %v1963_v36 = vld [vmem:[#allocation3] sm:$0xf]  ;;  %vm1163_vm12 = vcmask 582656  }
 0x266   :  { %796 = vst.msk [vmem:[#allocation3 + $0xc] sm:$0xff] %vm2797_vm4, %v835_v44  ;;  %v2178_v37 = vld [vmem:[#allocation3 + $0x4] sm:$0xf]  ;;  %v2192_v44 = vld [vmem:[%s3049_s4 + $0x30] sm:$0xff] }
 0x267   :  { %v810_v49 = vrot.slane %v808_v46, 4  ;;  %v809_v53 = vsel %vm2394_vm2, %v807_v52, %v808_v46  ;;  %v2193_v43 = vld [vmem:[%s3049_s4 + $0x38] sm:$0xff] }
 0x268   :  { %1082 = vmatpush.bf16.msra.mxu3 %v2193_v43 }
 0x26c   :  { %v836_v57 = vld [vmem:[#allocation2 + $0x10] sm:$0x33]  ;;  %1083 = vmatpush.bf16.msra.mxu3 %v2192_v44 }
 0x26d   :  { %v802_v47 = vld [vmem:[#allocation2 + $0x10] sm:$0x33]  ;;  %844 = vrot.lane.b32.xlu1 %v836_v57, %s2300_s17  ;;  %v2179_v35 = vld [vmem:[#allocation3 + $0x8] sm:$0xf0]  ;;  %v1965_v2 = vld [vmem:[#allocation3 + $0xc] sm:$0xf0] }
 0x26e   :  { %v792_v48 = vld [vmem:[#allocation2 + $0x10] sm:$0x33]  ;;  %v811_v50 = vrot.slane %v802_v47, 6  ;;  %v1964_v38 = vor.u32 %v2179_v35, %v1963_v36  ;;  %v1968_v63 = vor.u32 %v2178_v37, %v1965_v2 }
 0x26f   :  { %799 = vst.msk [vmem:[#allocation3 + $0x18] sm:$0x33] %vm2814_vm15, %v792_v48  ;;  %v2036_v48 = vld [vmem:[%s3047_s2 + $0x20] sm:$0xff] }
 0x270   :  { %v812_v51 = vsel %vm2394_vm2, %v810_v49, %v811_v50 }
 0x271   :  { %817 = vrot.lane.b32.xlu2 %v812_v51, %s2301_s30 }
 0x275   :  { %813 = vrot.lane.b32.xlu1 %v806_v45, %s2301_s30  ;;  %v2037_v45 = vld [vmem:[%s3047_s2 + $0x28] sm:$0xf] }
 0x279   :  { %815 = vrot.lane.b32.xlu2 %v809_v53, %s2301_s30 }
 0x2bf   :  { %v843_v56 = vpop.permute.xlu2 %842 }
 0x2c0   :  { %v847_v60 = vrot.slane %v843_v56, 4 }
 0x2c2   :  { %v850_v62 = vsel %vm162_vm7, %v843_v56, %v847_v60  ;;  %v2035_v56 = vld [vmem:[%s3047_s2 + $0x18] sm:$0xff] }
 0x2c3   :  { %856 = vst.msk [vmem:[#allocation3 + $0x48] sm:$0xff] %vm2797_vm4, %v850_v62  ;;  %v2191_v62 = vld [vmem:[%s3049_s4 + $0x28] sm:$0xff] }
 0x2c4   :  { %1084 = vmatpush.bf16.msra.mxu3 %v2191_v62 }
 0x2ca   :  { %v1987_v19 = vld [vmem:[#allocation3 + $0x48] sm:$0xf]  ;;  %v2184_v22 = vld [vmem:[#allocation3 + $0x4c] sm:$0xf] }
 0x2cb   :  { %v818_v1 = vpop.permute.xlu2 %817 }
 0x2cc   :  { %v821_v3 = vrot.slane %v818_v1, 4 }
 0x2ce   :  { %v824_v4 = vsel %vm112_vm6, %v818_v1, %v821_v3  ;;  %v2190_v1 = vld [vmem:[%s3049_s4 + $0x20] sm:$0xff]  ;;  %v2189_v3 = vld [vmem:[%s3049_s4 + $0x18] sm:$0xff] }
 0x2cf   :  { %833 = vst.msk [vmem:[#allocation3 + $0x30] sm:$0xff] %vm2797_vm4, %v824_v4  ;;  %v841_v6 = vpop.permute.xlu0 %840  ;;  %1085 = vmatpush.bf16.msra.mxu3 %v2190_v1  ;;  %v2188_v4 = vld [vmem:[%s3049_s4 + $0x10] sm:$0xff] }
 0x2d0   :  { %v846_v7 = vrot.slane %v841_v6, 4 }
 0x2d2   :  { %v849_v8 = vsel %vm162_vm7, %v841_v6, %v846_v7  ;;  %v2187_v6 = vld [vmem:[%s3049_s4 + $0x8] sm:$0xff]  ;;  %v2186_v7 = vld [vmem:[%s3049_s4] sm:$0xff] }
 0x2d3   :  { %v816_v9 = vpop.permute.xlu2 %815  ;;  %855 = vst.msk [vmem:[#allocation3 + $0x3c] sm:$0xff] %vm2797_vm4, %v849_v8  ;;  %1086 = vmatpush.bf16.msra.mxu3 %v2189_v3 }
 0x2d4   :  { %v820_v11 = vrot.slane %v816_v9, 4 }
 0x2d6   :  { %v823_v13 = vsel %vm112_vm6, %v816_v9, %v820_v11  ;;  %v1979_v30 = vld [vmem:[#allocation3 + $0x30] sm:$0xf]  ;;  %v2182_v31 = vld [vmem:[#allocation3 + $0x34] sm:$0xf] }
 0x2d7   :  { %832 = vst.msk [vmem:[#allocation3 + $0x24] sm:$0xff] %vm2797_vm4, %v823_v13  ;;  %1087 = vmatpush.bf16.msra.mxu3 %v2188_v4  ;;  %vm1155_vm4 = vcmask 615424  }
 0x2da   :  { %v2183_v28 = vld [vmem:[#allocation3 + $0x38] sm:$0xf0]  ;;  %v1981_v29 = vld [vmem:[#allocation3 + $0x3c] sm:$0xf0] }
 0x2db   :  { %v1980_v32 = vor.u32 %v2183_v28, %v1979_v30  ;;  %v1984_v33 = vor.u32 %v2182_v31, %v1981_v29  ;;  %1088 = vmatpush.bf16.msra.mxu3 %v2187_v6 }
 0x2de   :  { %v2181_v54 = vld [vmem:[#allocation3 + $0x20] sm:$0xf0]  ;;  %v1973_v59 = vld [vmem:[#allocation3 + $0x24] sm:$0xf0] }
 0x2df   :  { %v845_v14 = vpop.permute.xlu1 %844  ;;  %1089 = vmatpush.bf16.msra.mxu3 %v2186_v7 }
 0x2e0   :  { %v848_v15 = vrot.slane %v845_v14, 4 }
 0x2e2   :  { %v851_v16 = vsel %vm162_vm7, %v845_v14, %v848_v15  ;;  %vm1152_vm7 = vcmask 617472  }
 0x2e3   :  { %857 = vst.msk [vmem:[#allocation3 + $0x54] sm:$0x33] %vm2814_vm15, %v851_v16  ;;  %vm1339_vm15 = vcmask 1042432  }
 0x2e7   :  { %v814_v17 = vpop.permute.xlu1 %813 }
 0x2e8   :  { %v819_v18 = vrot.slane %v814_v17, 4 }
 0x2ea   :  { %v822_v20 = vsel %vm112_vm6, %v814_v17, %v819_v18  ;;  %v2185_v21 = vld [vmem:[#allocation3 + $0x50] sm:$0x30]  ;;  %v1989_v23 = vld [vmem:[#allocation3 + $0x54] sm:$0x30]  ;;  %vm1072_vm6 = vcmask 121856  }
 0x2eb   :  { %831 = vst.msk [vmem:[#allocation3 + $0x18] sm:$0xcc] %vm830_vm9, %v822_v20  ;;  %v1988_v24 = vor.u32 %v2185_v21, %v1987_v19  ;;  %v1992_v25 = vor.u32 %v2184_v22, %v1989_v23  ;;  %vm1405_vm9 = vcmask 289792  }
 0x2ed   :  { %v923_v26 = vsel %vm275_vm8, %v1988_v24, 0  ;;  %v926_v27 = vsel %vm275_vm8, %v1992_v25, 0 }
 0x2ee   :  { %932 = vmatpush.bf16.msra.mxu1 %v923_v26  ;;  %950 = vmatpush.bf16.msrb.mxu2 %v926_v27 }
 0x2f2   :  { %933 = vmatpush.bf16.msra.mxu1 %v1980_v32  ;;  %951 = vmatpush.bf16.msrb.mxu2 %v1984_v33  ;;  %v1971_v55 = vld [vmem:[#allocation3 + $0x18] sm:$0xf]  ;;  %v2180_v58 = vld [vmem:[#allocation3 + $0x1c] sm:$0xf] }
 0x2f3   :  { %v1972_v12 = vor.u32 %v2181_v54, %v1971_v55  ;;  %v1976_v34 = vor.u32 %v2180_v58, %v1973_v59  ;;  %v1140_v59 = vld [vmem:[%s3053_s8] sm:$0xff] }
 0x2f6   :  { %934 = vmatpush.bf16.msra.mxu1 %v1972_v12  ;;  %952 = vmatpush.bf16.msrb.mxu2 %v1976_v34 }
 0x2fa   :  { %935 = vmatpush.bf16.msra.mxu1 %v1964_v38  ;;  %953 = vmatpush.bf16.msrb.mxu2 %v1968_v63 }
 0x2fd   :  { %1993 = vmatmul.msk.bf16.vlgmr.msra.gmra.mxu1 %vm268_vm10, %v2177_v39  ;;  %1995 = vmatmul.msk.bf16.vlgmr.msrb.gmra.mxu2 %vm268_vm10, %v2177_v39  ;;  %v1141_v39 = vld [vmem:[%s3053_s8 + $0x8] sm:$0xff] }
 0x30d   :  { %1996 = vmatmul.msk.bf16.gmra.mxu2 %vm268_vm10, %v877_v41  ;;  %1994 = vmatmul.msk.bf16.gmra.mxu1 %vm268_vm10, %v877_v41 }
 0x37a   :  { %v937_v42 = vpop.f32.mrf.mxu1 }
 0x380   :  { %v955_v46 = vpop.f32.mrf.mxu2 }
 0x381   :  { %v2243_v61 = vpack.i.bf16 %v955_v46, %v937_v42 }
 0x382   :  { %v939_v57 = vpop.f32.mrf.mxu1 }
 0x383   :  { %2244 = vrot.lane.b32.xlu0 %v2243_v61, %s2302_s28 }
 0x388   :  { %v957_v47 = vpop.f32.mrf.mxu2 }
 0x389   :  { %v2248_v49 = vpack.i.bf16 %v957_v47, %v939_v57 }
 0x38a   :  { %v942_v50 = vpop.f32.mrf.mxu1 }
 0x38b   :  { %1129 = vperm.xlu0 %2241, %v2036_v48   ;;  %2249 = vrot.lane.b32.xlu1 %v2248_v49, %s2302_s28 }
 0x390   :  { %v960_v51 = vpop.f32.mrf.mxu2 }
 0x391   :  { %v2253_v52 = vpack.i.bf16 %v960_v51, %v942_v50 }
 0x392   :  { %v944_v53 = vpop.f32.mrf.mxu1 }
 0x393   :  { %1134 = vperm.xlu1 %2242, %v2037_v45   ;;  %2254 = vrot.lane.b32.xlu2 %v2253_v52, %s2302_s28 }
 0x398   :  { %v962_v60 = vpop.f32.mrf.mxu2 }
 0x39b   :  { %1124 = vperm.xlu2 %2240, %v2035_v56  }
 0x3ed   :  { %v2255_v24 = vpop.permute.xlu2 %2254 }
 0x3ee   :  { %v2257_v25 = vunpack.i.h.bf16 %v2255_v24  ;;  %v2256_v26 = vunpack.i.l.bf16 %v2255_v24 }
 0x3f0   :  { %v984_v27 = vsel %vm366_vm14, %v2256_v26, %v2257_v25  ;;  %v996_v28 = vmax.f32 %v960_v51, %v2257_v25 }
 0x3f1   :  { %v995_v29 = vmax.f32 %v942_v50, %v984_v27 }
 0x3f2   :  { %v1000_v30 = vpack.c.bf16 %v996_v28, %v996_v28 }
 0x3f3   :  { %v999_v31 = vpack.c.bf16 %v995_v29, %v995_v29 }
 0x3f5   :  { %v2245_v8 = vpop.permute.xlu0 %2244  ;;  %v1125_v58 = vpop.permute.xlu2 %1124 }
 0x3f6   :  { %v2247_v9 = vunpack.i.h.bf16 %v2245_v8  ;;  %v2246_v11 = vunpack.i.l.bf16 %v2245_v8 }
 0x3f8   :  { %v982_v14 = vsel %vm366_vm14, %v2246_v11, %v2247_v9  ;;  %v992_v17 = vmax.f32 %v955_v46, %v2247_v9 }
 0x3f9   :  { %v991_v20 = vmax.f32 %v937_v42, %v982_v14 }
 0x3fd   :  { %v2250_v13 = vpop.permute.xlu1 %2249  ;;  %v1130_v63 = vpop.permute.xlu0 %1129 }
 0x3fe   :  { %v2252_v15 = vunpack.i.h.bf16 %v2250_v13  ;;  %v2251_v16 = vunpack.i.l.bf16 %v2250_v13 }
 0x400   :  { %v994_v18 = vmax.f32 %v957_v47, %v2252_v15  ;;  %v983_v19 = vsel %vm366_vm14, %v2251_v16, %v2252_v15  ;;  %vm1160_vm14 = vcmask 584704   ;;  %v2082_v15 = vld [vmem:[%s3047_s2 + $0x38] sm:$0xff] }
 0x401   :  { %v993_v21 = vmax.f32 %v939_v57, %v983_v19  ;;  %v1142_v57 = vld [vmem:[%s3053_s8 + $0x10] sm:$0xf] }
 0x402   :  { %v998_v22 = vpack.c.bf16 %v994_v18, %v992_v17 }
 0x403   :  { %v997_v23 = vpack.c.bf16 %v993_v21, %v991_v20 }
 0x404   :  { %2033 = vmatmul.msk.bf16.vlgmr.msrb.gmra.mxu0 %vm1072_vm6, %v998_v22 }
 0x405   :  { %1090 = vmatmul.bf16.vlgmr.msra.gmra.mxu3 %v997_v23  ;;  %v1135_v61 = vpop.permute.xlu1 %1134 }
 0x414   :  { %2034 = vmatmul.msk.bf16.gmra.mxu0 %vm1072_vm6, %v1000_v30  ;;  %vm1400_vm6 = vcmask 320512  }
 0x415   :  { %1095 = vmatmul.bf16.gmra.mxu3 %v999_v31 }
 0x481   :  { %v1109_v32 = vpop.f32.mrf.mxu0 }
 0x488   :  { %v1091_v33 = vpop.f32.mrf.mxu3 }
 0x489   :  { %v1110_v54 = vadd.f32 %v1109_v32, %v1091_v33  ;;  %v1111_v55 = vpop.f32.mrf.mxu0 }
 0x48b   :  { %v1137_v12 = vmul.f32 %v1125_v58, %v1110_v54  ;;  %v2040_v58 = vld [vmem:[%s3046_s1 + $0x20] sm:$0x3] }
 0x48d   :  { %v1143_v34 = vadd.f32 %v1140_v59, %v1137_v12  ;;  %v1226_v59 = vunpack.c.l.b16 %v2040_v58 }
 0x48f   :  { %v1146_v35 = vmax.f32 %v1143_v34, 0.0  ;;  %v1228_v12 = vpack.c.b16 %v1226_v59, %v1226_v59  ;;  %v1340_v34 = vsel %vm1339_vm15, 4294967295, %v2303_v10 }
 0x490   :  { %v1093_v2 = vpop.f32.mrf.mxu3 }
 0x491   :  { %v1149_v36 = vpack.c.bf16 %v1146_v35, %v1146_v35  ;;  %v1112_v37 = vadd.f32 %v1111_v55, %v1093_v2  ;;  %v1114_v38 = vpop.f32.mrf.mxu0  ;;  %v2195_v55 = vld [vmem:[%s3046_s1 + $0x18] sm:$0xff]  ;;  %v1304_v35 = vld [vmem:[%s3050_s5 + $0x20] sm:$0xf] }
 0x492   :  { %v1322_v2 = vunpack.c.l.b16 %v1304_v35 }
 0x493   :  { %1153 = vst.msk [vmem:[#allocation2] sm:$0xf] %vm1152_vm7, %v1149_v36  ;;  %v1138_v0 = vmul.f32 %v1130_v63, %v1112_v37  ;;  %v1341_v36 = vsel %vm110_vm5, %v1340_v34, 0 }
 0x494   :  { %v1327_v37 = vpack.c.b16 %v1322_v2, %v1322_v2  ;;  %v2121_v2 = vld [vmem:[%s3047_s2 + $0x58] sm:$0xf] }
 0x495   :  { %v1144_v40 = vadd.f32 %v1141_v39, %v1138_v0  ;;  %v2203_v39 = vld [vmem:[%s3050_s5 + $0x18] sm:$0xff]  ;;  %v2202_v0 = vld [vmem:[%s3050_s5 + $0x10] sm:$0xff] }
 0x497   :  { %v1147_v41 = vmax.f32 %v1144_v40, 0.0 }
 0x498   :  { %v1096_v42 = vpop.f32.mrf.mxu3 }
 0x499   :  { %v1150_v43 = vpack.c.bf16 %v1147_v41, %v1147_v41  ;;  %v1115_v44 = vadd.f32 %v1114_v38, %v1096_v42  ;;  %v1116_v46 = vpop.f32.mrf.mxu0  ;;  %v1343_v38 = vand.u32 %v1341_v36, %v1327_v37  ;;  %v2201_v41 = vld [vmem:[%s3050_s5 + $0x8] sm:$0xff] }
 0x49a   :  { %v1157_v47 = vld [vmem:[#allocation2] sm:$0xf]  ;;  %v2081_v46 = vld [vmem:[%s3047_s2 + $0x30] sm:$0xff] }
 0x49b   :  { %1154 = vst.msk [vmem:[#allocation2 + $0x8] sm:$0xf] %vm1152_vm7, %v1150_v43  ;;  %v1139_v48 = vmul.f32 %v1135_v61, %v1115_v44  ;;  %v1191_v62 = vld [vmem:[#allocation2] sm:$0xf]  ;;  %1348 = vmatpush.bf16.msra.mxu2 %v1343_v38  ;;  %vm1408_vm7 = vcmask 287744  }
 0x49c   :  { %1161 = vst.msk [vmem:[#allocation3] sm:$0xf] %vm1160_vm14, %v1157_v47  ;;  %v1165_v8 = vld [vmem:[#allocation2] sm:$0xf] }
 0x49d   :  { %v1145_v49 = vadd.f32 %v1142_v57, %v1139_v48  ;;  %v1171_v11 = vrot.slane %v1165_v8, 6  ;;  %v2083_v44 = vld [vmem:[%s3047_s2 + $0x40] sm:$0xf] }
 0x49e   :  { %v2200_v57 = vld [vmem:[%s3050_s5] sm:$0xff] }
 0x49f   :  { %v1148_v50 = vmax.f32 %v1145_v49, 0.0  ;;  %v1172_v13 = vrot.slane %v1171_v11, 4  ;;  %1349 = vmatpush.bf16.msra.mxu2 %v2203_v39 }
 0x4a0   :  { %v1098_v51 = vpop.f32.mrf.mxu3 }
 0x4a1   :  { %v1151_v45 = vpack.c.bf16 %v1148_v50, %v1148_v50 }
 0x4a2   :  { %v1192_v52 = vld [vmem:[#allocation2 + $0x8] sm:$0xf] }
 0x4a3   :  { %v1158_v53 = vld [vmem:[#allocation2 + $0x8] sm:$0xf]  ;;  %1156 = vst.msk [vmem:[#allocation2 + $0x10] sm:$0x3] %vm1155_vm4, %v1151_v45  ;;  %1199 = vrot.lane.b32.xlu0 %v1192_v52, %s2300_s17  ;;  %v2047_v33 = vld [vmem:[#allocation3] sm:$0xf]  ;;  %1350 = vmatpush.bf16.msra.mxu2 %v2202_v0 }
 0x4a4   :  { %v1166_v56 = vld [vmem:[#allocation2 + $0x8] sm:$0xf]  ;;  %1162 = vst.msk [vmem:[#allocation3 + $0xc] sm:$0xf] %vm1160_vm14, %v1158_v53 }
 0x4a5   :  { %v1173_v60 = vrot.slane %v1166_v56, 6 }
 0x4a7   :  { %v1175_v6 = vrot.slane %v1173_v60, 4  ;;  %v1174_v14 = vsel %vm2394_vm2, %v1172_v13, %v1173_v60  ;;  %1351 = vmatpush.bf16.msra.mxu2 %v2201_v41 }
 0x4aa   :  { %v1193_v1 = vld [vmem:[#allocation2 + $0x10] sm:$0x3] }
 0x4ab   :  { %v1167_v3 = vld [vmem:[#allocation2 + $0x10] sm:$0x3]  ;;  %1197 = vrot.lane.b32.xlu0 %v1191_v62, %s2300_s17  ;;  %1201 = vrot.lane.b32.xlu1 %v1193_v1, %s2300_s17  ;;  %v2196_v32 = vld [vmem:[#allocation3 + $0x8] sm:$0xf0] }
 0x4ac   :  { %v1159_v4 = vld [vmem:[#allocation2 + $0x10] sm:$0x3]  ;;  %v1176_v7 = vrot.slane %v1167_v3, 6  ;;  %v2048_v54 = vor.u32 %v2196_v32, %v2047_v33  ;;  %1352 = vmatpush.bf16.msra.mxu2 %v2200_v57  ;;  %v1385_v1 = vld [vmem:[%s3054_s9] sm:$0xff] }
 0x4ad   :  { %1164 = vst.msk [vmem:[#allocation3 + $0x18] sm:$0x3] %vm1163_vm12, %v1159_v4 }
 0x4ae   :  { %v1177_v9 = vsel %vm2394_vm2, %v1175_v6, %v1176_v7 }
 0x4af   :  { %1182 = vrot.lane.b32.xlu2 %v1177_v9, %s2301_s30 }
 0x4b3   :  { %1178 = vrot.lane.b32.xlu1 %v1171_v11, %s2301_s30  ;;  %v1386_v11 = vld [vmem:[%s3054_s9 + $0x8] sm:$0xff] }
 0x4b7   :  { %1180 = vrot.lane.b32.xlu2 %v1174_v14, %s2301_s30 }
 0x4bf   :  { %1374 = vperm.xlu2 %2240, %v2082_v15  }
 0x509   :  { %v1183_v16 = vpop.permute.xlu2 %1182 }
 0x50a   :  { %1190 = vst.msk [vmem:[#allocation3 + $0x30] sm:$0xf] %vm1160_vm14, %v1183_v16 }
 0x511   :  { %v1181_v17 = vpop.permute.xlu2 %1180  ;;  %v2055_v27 = vld [vmem:[#allocation3 + $0x30] sm:$0xf] }
 0x512   :  { %1189 = vst.msk [vmem:[#allocation3 + $0x24] sm:$0xf] %vm1160_vm14, %v1181_v17 }
 0x515   :  { %v1200_v18 = vpop.permute.xlu0 %1199 }
 0x516   :  { %1207 = vst.msk [vmem:[#allocation3 + $0x48] sm:$0xf] %vm1160_vm14, %v1200_v18 }
 0x519   :  { %v2197_v30 = vld [vmem:[#allocation3 + $0x20] sm:$0xf0]  ;;  %v1375_v8 = vpop.permute.xlu2 %1374 }
 0x51d   :  { %v1198_v19 = vpop.permute.xlu0 %1197  ;;  %v1202_v20 = vpop.permute.xlu1 %1201  ;;  %v2059_v22 = vld [vmem:[#allocation3 + $0x48] sm:$0xf] }
 0x51e   :  { %1206 = vst.msk [vmem:[#allocation3 + $0x3c] sm:$0xf] %vm1160_vm14, %v1198_v19  ;;  %v1387_v19 = vld [vmem:[%s3054_s9 + $0x10] sm:$0xf]  ;;  %vm1653_vm14 = vcmask 56320  }
 0x51f   :  { %1208 = vst.msk [vmem:[#allocation3 + $0x54] sm:$0x3] %vm1163_vm12, %v1202_v20 }
 0x525   :  { %v1179_v21 = vpop.permute.xlu1 %1178  ;;  %v2198_v26 = vld [vmem:[#allocation3 + $0x38] sm:$0xf0] }
 0x526   :  { %1188 = vst.msk [vmem:[#allocation3 + $0x18] sm:$0xc] %vm1187_vm13, %v1179_v21  ;;  %v2199_v23 = vld [vmem:[#allocation3 + $0x50] sm:$0x30]  ;;  %v2056_v28 = vor.u32 %v2198_v26, %v2055_v27  ;;  %vm1728_vm13 = vcmask 8192  }
 0x527   :  { %v2060_v24 = vor.u32 %v2199_v23, %v2059_v22 }
 0x529   :  { %v1259_v25 = vsel %vm275_vm8, %v2060_v24, 0 }
 0x52a   :  { %1265 = vmatpush.bf16.msrb.mxu1 %v1259_v25 }
 0x52d   :  { %v2051_v29 = vld [vmem:[#allocation3 + $0x18] sm:$0xf] }
 0x52e   :  { %1266 = vmatpush.bf16.msrb.mxu1 %v2056_v28  ;;  %v2052_v31 = vor.u32 %v2197_v30, %v2051_v29 }
 0x532   :  { %1267 = vmatpush.bf16.msrb.mxu1 %v2052_v31 }
 0x536   :  { %1268 = vmatpush.bf16.msrb.mxu1 %v2048_v54 }
 0x539   :  { %2061 = vmatmul.msk.bf16.vlgmr.msrb.gmra.mxu1 %vm268_vm10, %v2195_v55 }
 0x549   :  { %2062 = vmatmul.msk.bf16.gmra.mxu1 %vm268_vm10, %v1228_v12 }
 0x5b6   :  { %v1270_v63 = vpop.f32.mrf.mxu1 }
 0x5be   :  { %v1272_v40 = vpop.f32.mrf.mxu1 }
 0x5bf   :  { %v2258_v42 = vpack.i.bf16 %v1272_v40, %v1270_v63 }
 0x5c1   :  { %2259 = vrot.lane.b32.xlu0 %v2258_v42, %s2302_s28 }
 0x5c6   :  { %v1275_v43 = vpop.f32.mrf.mxu1 }
 0x5c7   :  { %1286 = vrot.lane.b32.xlu1 %v1275_v43, %s2302_s28 }
 0x5c9   :  { %1379 = vperm.xlu0 %2241, %v2083_v44  }
 0x5ce   :  { %v1277_v61 = vpop.f32.mrf.mxu1 }
 0x5cf   :  { %1369 = vperm.xlu1 %2242, %v2081_v46  }
 0x633   :  { %v2260_v47 = vpop.permute.xlu0 %2259 }
 0x634   :  { %v2262_v48 = vunpack.i.h.bf16 %v2260_v47  ;;  %v2261_v49 = vunpack.i.l.bf16 %v2260_v47 }
 0x636   :  { %v1292_v50 = vmax.f32 %v1272_v40, %v2262_v48  ;;  %v1291_v51 = vmax.f32 %v1270_v63, %v2261_v49 }
 0x638   :  { %v1294_v45 = vpack.c.bf16 %v1292_v50, %v1291_v51  ;;  %v2204_v51 = vld [vmem:[%s3046_s1 + $0x24] sm:$0xff] }
 0x639   :  { %v1287_v52 = vpop.permute.xlu1 %1286 }
 0x63a   :  { %2079 = vmatmul.msk.bf16.vlgmr.msra.gmra.mxu2 %vm1332_vm1, %v1294_v45  ;;  %v1293_v53 = vmax.f32 %v1275_v43, %v1287_v52  ;;  %v2086_v45 = vld [vmem:[%s3046_s1 + $0x2c] sm:$0x3] }
 0x63b   :  { %v1380_v17 = vpop.permute.xlu0 %1379  ;;  %v1471_v52 = vunpack.c.l.b16 %v2086_v45 }
 0x63c   :  { %v1295_v56 = vpack.c.bf16 %v1293_v53, %v1293_v53 }
 0x63d   :  { %v1473_v53 = vpack.c.b16 %v1471_v52, %v1471_v52 }
 0x641   :  { %v1370_v60 = vpop.permute.xlu1 %1369 }
 0x64a   :  { %2080 = vmatmul.msk.bf16.gmra.mxu2 %vm1332_vm1, %v1295_v56 }
 0x6bd   :  { %v1354_v62 = vpop.f32.mrf.mxu2 }
 0x6be   :  { %v1382_v3 = vmul.f32 %v1370_v60, %v1354_v62  ;;  %v1545_v60 = vld [vmem:[%s3051_s6 + $0x10] sm:$0x3] }
 0x6bf   :  { %v1555_v62 = vunpack.c.l.b16 %v1545_v60 }
 0x6c0   :  { %v1388_v4 = vadd.f32 %v1385_v1, %v1382_v3 }
 0x6c1   :  { %v1558_v3 = vpack.c.b16 %v1555_v62, %v1555_v62 }
 0x6c2   :  { %v1391_v6 = vmax.f32 %v1388_v4, 0.0 }
 0x6c4   :  { %v1394_v7 = vpack.c.bf16 %v1391_v6, %v1391_v6 }
 0x6c5   :  { %v1356_v9 = vpop.f32.mrf.mxu2 }
 0x6c6   :  { %v1383_v13 = vmul.f32 %v1375_v8, %v1356_v9  ;;  %1398 = vst.msk [vmem:[#allocation2] sm:$0xf] %vm1397_vm3, %v1394_v7  ;;  %v2210_v7 = vld [vmem:[%s3051_s6 + $0x8] sm:$0xff] }
 0x6c8   :  { %v1389_v14 = vadd.f32 %v1386_v11, %v1383_v13  ;;  %v2120_v11 = vld [vmem:[%s3047_s2 + $0x50] sm:$0xff]  ;;  %v2119_v13 = vld [vmem:[%s3047_s2 + $0x48] sm:$0xff] }
 0x6ca   :  { %v1392_v15 = vmax.f32 %v1389_v14, 0.0 }
 0x6cc   :  { %v1395_v16 = vpack.c.bf16 %v1392_v15, %v1392_v15  ;;  %v2209_v15 = vld [vmem:[%s3051_s6] sm:$0xff] }
 0x6cd   :  { %v1359_v18 = vpop.f32.mrf.mxu2  ;;  %v1402_v20 = vld [vmem:[#allocation2] sm:$0xf] }
 0x6ce   :  { %v1384_v21 = vmul.f32 %v1380_v17, %v1359_v18  ;;  %1399 = vst.msk [vmem:[#allocation2 + $0x8] sm:$0xf] %vm1397_vm3, %v1395_v16  ;;  %v1436_v30 = vld [vmem:[#allocation2] sm:$0xf] }
 0x6cf   :  { %1406 = vst.msk [vmem:[#allocation3] sm:$0xf] %vm1405_vm9, %v1402_v20  ;;  %v1410_v58 = vld [vmem:[#allocation2] sm:$0xf] }
 0x6d0   :  { %v1390_v22 = vadd.f32 %v1387_v19, %v1384_v21  ;;  %v1416_v12 = vrot.slane %v1410_v58, 6  ;;  %v1614_v58 = vld [vmem:[%s3055_s10] sm:$0xff] }
 0x6d2   :  { %v1393_v23 = vmax.f32 %v1390_v22, 0.0  ;;  %v1417_v34 = vrot.slane %v1416_v12, 4 }
 0x6d4   :  { %v1396_v24 = vpack.c.bf16 %v1393_v23, %v1393_v23 }
 0x6d5   :  { %v1361_v25 = vpop.f32.mrf.mxu2  ;;  %v1437_v26 = vld [vmem:[#allocation2 + $0x8] sm:$0xf] }
 0x6d6   :  { %v1403_v27 = vld [vmem:[#allocation2 + $0x8] sm:$0xf]  ;;  %1444 = vrot.lane.b32.xlu2 %v1437_v26, %s2300_s17  ;;  %1401 = vst.msk [vmem:[#allocation2 + $0x10] sm:$0x3] %vm1400_vm6, %v1396_v24  ;;  %v2093_v49 = vld [vmem:[#allocation3] sm:$0xf] }
 0x6d7   :  { %v1411_v28 = vld [vmem:[#allocation2 + $0x8] sm:$0xf]  ;;  %1407 = vst.msk [vmem:[#allocation3 + $0xc] sm:$0xf] %vm1405_vm9, %v1403_v27 }
 0x6d8   :  { %v1418_v29 = vrot.slane %v1411_v28, 6 }
 0x6da   :  { %v1420_v54 = vrot.slane %v1418_v29, 4  ;;  %v1419_v35 = vsel %vm2394_vm2, %v1417_v34, %v1418_v29 }
 0x6dd   :  { %v1438_v31 = vld [vmem:[#allocation2 + $0x10] sm:$0x3] }
 0x6de   :  { %v1412_v32 = vld [vmem:[#allocation2 + $0x10] sm:$0x3]  ;;  %1442 = vrot.lane.b32.xlu2 %v1436_v30, %s2300_s17  ;;  %1446 = vrot.lane.b32.xlu0 %v1438_v31, %s2300_s17  ;;  %v2205_v48 = vld [vmem:[#allocation3 + $0x8] sm:$0xf0]  ;;  %v1615_v31 = vld [vmem:[%s3055_s10 + $0x8] sm:$0xff] }
 0x6df   :  { %v1404_v33 = vld [vmem:[#allocation2 + $0x10] sm:$0x3]  ;;  %v1421_v55 = vrot.slane %v1412_v32, 6  ;;  %v2094_v50 = vor.u32 %v2205_v48, %v2093_v49 }
 0x6e0   :  { %1409 = vst.msk [vmem:[#allocation3 + $0x18] sm:$0x3] %vm1408_vm7, %v1404_v33  ;;  %v1616_v33 = vld [vmem:[%s3055_s10 + $0x10] sm:$0xf]  ;;  %s2305_s10 = smov 121  }
 0x6e1   :  { %v1422_v59 = vsel %vm2394_vm2, %v1420_v54, %v1421_v55  ;;  %vm1432_vm2 = vcmask 289794  }
 0x6e2   :  { %1427 = vrot.lane.b32.xlu1 %v1422_v59, %s2301_s30 }
 0x6e6   :  { %1423 = vrot.lane.b32.xlu0 %v1416_v12, %s2301_s30 }
 0x6ea   :  { %1425 = vrot.lane.b32.xlu1 %v1419_v35, %s2301_s30 }
 0x6f2   :  { %1608 = vperm.xlu1 %2242, %v2121_v2  }
 0x730   :  { %v1445_v36 = vpop.permute.xlu2 %1444 }
 0x731   :  { %1452 = vst.msk [vmem:[#allocation3 + $0x48] sm:$0xf] %vm1405_vm9, %v1445_v36 }
 0x738   :  { %v1443_v37 = vpop.permute.xlu2 %1442  ;;  %v2105_v39 = vld [vmem:[#allocation3 + $0x48] sm:$0xf] }
 0x739   :  { %1451 = vst.msk [vmem:[#allocation3 + $0x3c] sm:$0xf] %vm1405_vm9, %v1443_v37 }
 0x740   :  { %v2207_v44 = vld [vmem:[#allocation3 + $0x38] sm:$0xf0] }
 0x750   :  { %v1447_v38 = vpop.permute.xlu0 %1446 }
 0x751   :  { %1453 = vst.msk [vmem:[#allocation3 + $0x54] sm:$0x3] %vm1408_vm7, %v1447_v38  ;;  %v1623_v38 = vld [vmem:[%s3056_s11] sm:$0x1] }
 0x754   :  { %v1428_v63 = vpop.permute.xlu1 %1427 }
 0x755   :  { %1435 = vst.msk [vmem:[#allocation3 + $0x30] sm:$0xf] %vm1405_vm9, %v1428_v63  ;;  %v1651_v63 = vld [vmem:[%s3057_s12] sm:$0x7f]  ;;  %s2306_s12 = smov [#allocation4]  }
 0x756   :  { %2124 = vmatpush.msk.msrb.mxu2 %vm618_vm11, %v1651_v63 }
 0x758   :  { %v1424_v5 = vpop.permute.xlu0 %1423  ;;  %v2208_v0 = vld [vmem:[#allocation3 + $0x50] sm:$0x30] }
 0x759   :  { %1433 = vst.msk [vmem:[#allocation3 + $0x18] sm:$0xc] %vm1432_vm2, %v1424_v5  ;;  %v2106_v40 = vor.u32 %v2208_v0, %v2105_v39  ;;  %v1652_v0 = vld [vmem:[%s3058_s13] sm:$0x1]  ;;  %s1737_s13 = sshll.u32 %s2306_s12, 4  ;;  %s1738_s13 = int_to_ptr.vmem [resolvable:$true] %s1737_s13 }
 0x75b   :  { %v1504_v42 = vsel %vm275_vm8, %v2106_v40, 0  ;;  %vm1568_vm8 = vcmask 1040384  }
 0x75c   :  { %v1426_v41 = vpop.permute.xlu1 %1425  ;;  %v2101_v43 = vld [vmem:[#allocation3 + $0x30] sm:$0xf]  ;;  %1510 = vmatpush.bf16.msrb.mxu3 %v1504_v42  ;;  %v1569_v56 = vsel %vm1568_vm8, 4294967295, %v2303_v10 }
 0x75d   :  { %1434 = vst.msk [vmem:[#allocation3 + $0x24] sm:$0xf] %vm1405_vm9, %v1426_v41  ;;  %v2102_v46 = vor.u32 %v2207_v44, %v2101_v43  ;;  %v1570_v1 = vsel %vm75_vm0, %v1569_v56, 0  ;;  %vm1561_vm0 = vcmask 285696  }
 0x75e   :  { %v1572_v4 = vand.u32 %v1570_v1, %v1558_v3 }
 0x760   :  { %1511 = vmatpush.bf16.msrb.mxu3 %v2102_v46  ;;  %v2097_v61 = vld [vmem:[#allocation3 + $0x18] sm:$0xf]  ;;  %1579 = vmatpush.bf16.msra.mxu0 %v1572_v4 }
 0x764   :  { %v2206_v57 = vld [vmem:[#allocation3 + $0x20] sm:$0xf0]  ;;  %1580 = vmatpush.bf16.msra.mxu0 %v2210_v7  ;;  %v1609_v28 = vpop.permute.xlu1 %1608 }
 0x765   :  { %v2098_v47 = vor.u32 %v2206_v57, %v2097_v61 }
 0x767   :  { %1512 = vmatpush.bf16.msrb.mxu3 %v2098_v47 }
 0x768   :  { %1581 = vmatpush.bf16.msra.mxu0 %v2209_v15 }
 0x76b   :  { %1513 = vmatpush.bf16.msrb.mxu3 %v2094_v50 }
 0x76e   :  { %2107 = vmatmul.msk.bf16.vlgmr.msrb.gmra.mxu3 %vm268_vm10, %v2204_v51 }
 0x77e   :  { %2108 = vmatmul.msk.bf16.gmra.mxu3 %vm268_vm10, %v1473_v53  ;;  %vm1624_vm10 = vcmask 162816  }
 0x7f1   :  { %v1515_v6 = vpop.f32.mrf.mxu3 }
 0x7f9   :  { %v1517_v8 = vpop.f32.mrf.mxu3 }
 0x7fa   :  { %v2263_v9 = vpack.i.bf16 %v1517_v8, %v1515_v6 }
 0x7fc   :  { %2264 = vrot.lane.b32.xlu2 %v2263_v9, %s2302_s28 }
 0x801   :  { %v1520_v10 = vpop.f32.mrf.mxu3 }
 0x802   :  { %1531 = vrot.lane.b32.xlu0 %v1520_v10, %s2302_s28 }
 0x804   :  { %1603 = vperm.xlu2 %2240, %v2120_v11  }
 0x809   :  { %v1522_v14 = vpop.f32.mrf.mxu3 }
 0x80a   :  { %1598 = vperm.xlu0 %2241, %v2119_v13  }
 0x856   :  { %v2265_v16 = vpop.permute.xlu2 %2264 }
 0x857   :  { %v2267_v17 = vunpack.i.h.bf16 %v2265_v16  ;;  %v2266_v18 = vunpack.i.l.bf16 %v2265_v16 }
 0x859   :  { %v1537_v19 = vmax.f32 %v1517_v8, %v2267_v17  ;;  %v1536_v20 = vmax.f32 %v1515_v6, %v2266_v18 }
 0x85b   :  { %v1539_v21 = vpack.c.bf16 %v1537_v19, %v1536_v20 }
 0x85d   :  { %2117 = vmatmul.msk.bf16.vlgmr.msra.gmra.mxu0 %vm1561_vm0, %v1539_v21 }
 0x85e   :  { %v1604_v27 = vpop.permute.xlu2 %1603 }
 0x874   :  { %v1532_v22 = vpop.permute.xlu0 %1531 }
 0x875   :  { %v1538_v23 = vmax.f32 %v1520_v10, %v1532_v22 }
 0x877   :  { %v1540_v24 = vpack.c.bf16 %v1538_v23, %v1538_v23 }
 0x879   :  { %2118 = vmatmul.msk.bf16.gmra.mxu0 %vm1561_vm0, %v1540_v24 }
 0x87c   :  { %v1599_v30 = vpop.permute.xlu0 %1598 }
 0x8da   :  { %v1583_v25 = vpop.f32.mrf.mxu0 }
 0x8db   :  { %v1611_v54 = vmul.f32 %v1599_v30, %v1583_v25 }
 0x8dd   :  { %v1617_v34 = vadd.f32 %v1614_v58, %v1611_v54 }
 0x8df   :  { %v1620_v37 = vmax.f32 %v1617_v34, 0.0 }
 0x8e2   :  { %v1585_v26 = vpop.f32.mrf.mxu0 }
 0x8e3   :  { %v1612_v29 = vmul.f32 %v1604_v27, %v1585_v26 }
 0x8e5   :  { %v1618_v59 = vadd.f32 %v1615_v31, %v1612_v29 }
 0x8e7   :  { %v1621_v2 = vmax.f32 %v1618_v59, 0.0 }
 0x8f6   :  { %v1588_v32 = vpop.f32.mrf.mxu0 }
 0x8f7   :  { %v1613_v55 = vmul.f32 %v1609_v28, %v1588_v32 }
 0x8f9   :  { %v1619_v12 = vadd.f32 %v1616_v33, %v1613_v55 }
 0x8fb   :  { %v1622_v35 = vmax.f32 %v1619_v12, 0.0 }
 0x8fd   :  { %2122 = vmatpush.msk.msra.mxu1 %vm110_vm5, %v1622_v35 }
 0x8fe   :  { %v1590_v36 = vpop.f32.mrf.mxu0 }
 0x8ff   :  { %1645 = vmatpush.msra.mxu1 %v1621_v2 }
 0x901   :  { %1646 = vmatpush.msra.mxu1 %v1620_v37 }
 0x902   :  { %2123 = vmatmul.msk.f32.vlgmr.msra.gmra.mxu1 %vm1624_vm10, %v1623_v38 }
 0x903   :  { %2126 = vmatpush.msk.msrb.mxu1 %vm618_vm11, %v1651_v63 }
 0x97f   :  { %v1648_v5 = vpop.f32.mrf.mxu1 }
 0x980   :  { %1680 = vrot.lane.b32.xlu1 %v1648_v5, %s2305_s10  ;;  %2125 = vmatmul.msk.f32.vlgmr.msrb.gmra.mxu2 %vm1653_vm14, %v1648_v5 }
 0x9f2   :  { %v1681_v39 = vpop.permute.xlu1 %1680 }
 0x9f3   :  { %2127 = vmatmul.msk.f32.vlgmr.msrb.gmra.mxu1 %vm1653_vm14, %v1681_v39 }
 0xa03   :  { %v1677_v40 = vpop.f32.mrf.mxu2 }
 0xa04   :  { %v1678_v42 = vadd.f32 %v1677_v40, %v1652_v0 }
 0xa70   :  { %v1701_v41 = vpop.f32.mrf.mxu1 }
 0xa71   :  { %v1702_v43 = vadd.f32 %v1701_v41, %v1652_v0 }
 0xa73   :  { %v1704_v44 = vmax.f32 %v1678_v42, %v1702_v43 }
 0xa75   :  { %v1705_v46 = vsub.f32 %v1678_v42, %v1704_v44  ;;  %v1708_v61 = vsub.f32 %v1702_v43, %v1704_v44 }
 0xa77   :  { %v1706_v57 = vmul.f32 1.442695, %v1705_v46  ;;  %v1709_v47 = vmul.f32 1.442695, %v1708_v61 }
 0xa79   :  { %2268 = vpow2.f32 %v1706_v57 }
 0xa7a   :  { %2270 = vpow2.f32 %v1709_v47 }
 0xa7f   :  { %v2269_v48 = vpop.eup %2268 }
 0xa80   :  { %v2271_v49 = vpop.eup %2270 }
 0xa81   :  { %v1711_v50 = vadd.f32 %v2271_v49, %v2269_v48 }
 0xa83   :  { %2272 = vrcp.f32 %v1711_v50  ;;  %v1723_v53 = vand.u32 2147483648, %v1711_v50  ;;  %v1721_v60 = vand.u32 2147483647, %v1711_v50  ;;  %vm1717_vm11 = vweird.f32 %v1711_v50 }
 0xa85   :  { %v1724_v1 = vor.u32 1.1754944e-38, %v1723_v53  ;;  %vm1722_vm12 = vcmp.eq.f32.partialorder %v1721_v60, 8.507059e+37 }
 0xa89   :  { %v2273_v51 = vpop.eup %2272 }
 0xa8a   :  { %v1713_v45 = vmul.f32 %v2273_v51, %v1711_v50  ;;  %vm1718_vm5 = vweird.f32 %v2273_v51 }
 0xa8b   :  { %vm1719_vm4 = vmor %vm1717_vm11, %vm1718_vm5 }
 0xa8c   :  { %v1714_v52 = vsub.f32 1.0, %v1713_v45 }
 0xa8e   :  { %v1715_v56 = vmul.f32 %v2273_v51, %v1714_v52 }
 0xa90   :  { %v1716_v62 = vadd.f32 %v2273_v51, %v1715_v56 }
 0xa92   :  { %v1720_v3 = vsel %vm1719_vm4, %v2273_v51, %v1716_v62 }
 0xa93   :  { %v1725_v4 = vsel %vm1722_vm12, %v1724_v1, %v1720_v3 }
 0xa94   :  { %v1727_v6 = vmul.f32 %v2269_v48, %v1725_v4  ;;  %v1730_v7 = vmul.f32 %v2271_v49, %v1725_v4 }
 0xa96   :  { %1729 = vst.msk [vmem:[#allocation4] sm:$0x1] %vm1728_vm13, %v1727_v6 }
 0xa97   :  { %1731 = vst.msk [vmem:[#allocation4 + $0x1] sm:$0x1] %vm1728_vm13, %v1730_v7 }
 0xa98   :  { %1742 = dma.vmem_to_hbm [thread:$0]  %s1738_s13, 32, %s1740_s29, [#allocation5]  }
 0xa99   :  { %2298 = dma.done.wait [#allocation5], 32  }
 0xa9a   :  { %2299 = vsyncadd [#allocation5], 4294967264 }
 0xa9b   :  { %1747 = vsyncpa [#allocation5], 1 }

</bundles_post_ra>
